<compile_context>
chip_gen: v5e
topology: v5e:2x2
jax: 0.10.0
libtpu: 0.0.40
codegen_flags: <defaults>
</compile_context>

<pallas_src>
import functools

import jax
import jax.numpy as jnp
import numpy as np
from jax.experimental import pallas as pl
from jax.experimental.pallas import tpu as pltpu

# ---------------- small, DeiT-like configuration ----------------
PATCH = 16          # patch size (same as the real model)
IMG = 32            # small image -> 2x2 = 4 patches
IN_CHANS = 3
EMBED_DIM = 32      # "original_embedding_dim"
DEPTH = 2
NUM_HEADS = 4
MLP_RATIO = 4
LN_EPS = 1e-6       # timm ViT uses LayerNorm(eps=1e-6)
N_PATCHES = (IMG // PATCH) ** 2
SEQ = N_PATCHES + 2  # cls + dist + patches

_BF16_WEIGHT_KEYS = frozenset({"patch_w", "wq", "wk", "wv", "wproj", "w1", "w2"})


# ---------------- shared math helpers (trace inside kernel AND reference) ----
def _layernorm(x, g, b, eps=LN_EPS):
    mu = jnp.mean(x, axis=-1, keepdims=True)
    xc = x - mu
    var = jnp.mean(xc * xc, axis=-1, keepdims=True)
    return xc * jax.lax.rsqrt(var + eps) * g + b


def _erf_approx(x):
    # Abramowitz & Stegun 7.1.26 rational approximation, |error| < 1.5e-7.
    # Uses only exp / mul / add / abs / where, all of which lower in Mosaic.
    a1, a2, a3, a4, a5 = 0.254829592, -0.284496736, 1.421413741, -1.453152027, 1.061405429
    p = 0.3275911
    ax = jnp.abs(x)
    t = 1.0 / (1.0 + p * ax)
    poly = ((((a5 * t + a4) * t + a3) * t + a2) * t + a1) * t
    e = 1.0 - poly * jnp.exp(-ax * ax)
    return jnp.where(x >= 0.0, e, -e)


def _gelu_exactish(x):
    # exact erf GELU (matching torch.nn.GELU) up to the 1.5e-7 erf approximation error.
    return 0.5 * x * (1.0 + _erf_approx(x * 0.7071067811865476))


# ---------------- Pallas kernel: one grid step == one transformer block ------
def _vit_block_kernel(patches_ref, pw_ref, pb_ref, cls_ref, dist_ref, pos_ref,
                      ln1g_ref, ln1b_ref,
                      wq_ref, bq_ref, wk_ref, bk_ref, wv_ref, bv_ref,
                      wproj_ref, bproj_ref,
                      ln2g_ref, ln2b_ref,
                      w1_ref, b1_ref, w2_ref, b2_ref,
                      normg_ref, normb_ref,
                      out_ref, x_scr, *, num_heads):
    d = pl.program_id(1)
    bf16 = jnp.bfloat16

    # ---- patch embedding + token concat + pos embed: only on the first depth step ----
    @pl.when(d == 0)
    def _embed():
        tok = (jnp.dot(patches_ref[0], pw_ref[...],
                       preferred_element_type=jnp.float32) + pb_ref[...])     # (N, D) f32
        x_scr[...] = (jnp.concatenate([cls_ref[...], dist_ref[...], tok], axis=0)
                      + pos_ref[...])                                          # (S, D)

    x = x_scr[...]                                    # (S, D) f32, carried across depth
    S, D = x.shape
    dh = D // num_heads
    scale = float(dh) ** -0.5

    # ---- attention branch ----
    h = _layernorm(x, ln1g_ref[0], ln1b_ref[0])
    hb = h.astype(bf16)
    q = (jnp.dot(hb, wq_ref[0], preferred_element_type=jnp.float32) + bq_ref[0]) * scale
    k = jnp.dot(hb, wk_ref[0], preferred_element_type=jnp.float32) + bk_ref[0]
    v = jnp.dot(hb, wv_ref[0], preferred_element_type=jnp.float32) + bv_ref[0]

    wproj = wproj_ref[0]                              # (D, D) bf16
    proj = jnp.zeros((S, D), jnp.float32)             # lane-dense accumulator
    for hh in range(num_heads):
        lo, hi = hh * dh, (hh + 1) * dh
        qh = q[:, lo:hi].astype(bf16)
        kh = k[:, lo:hi].astype(bf16)
        vh = v[:, lo:hi].astype(bf16)
        s = jax.lax.dot_general(qh, kh, (((1,), (1,)), ((), ())),
                                preferred_element_type=jnp.float32)           # (S, S)
        s = s - jnp.max(s, axis=-1, keepdims=True)
        p = jnp.exp(s)
        p = p / jnp.sum(p, axis=-1, keepdims=True)                            # exact divide
        oh = jnp.dot(p.astype(bf16), vh, preferred_element_type=jnp.float32)  # (S, dh)
        # head output folded straight into its W_proj row slab: no concatenate.
        proj = proj + jnp.dot(oh.astype(bf16), wproj[lo:hi, :],
                              preferred_element_type=jnp.float32)
    x = x + proj + bproj_ref[0]

    # ---- MLP branch ----
    h2 = _layernorm(x, ln2g_ref[0], ln2b_ref[0])
    h2 = (jnp.dot(h2.astype(bf16), w1_ref[0], preferred_element_type=jnp.float32)
          + b1_ref[0])
    h2 = _gelu_exactish(h2)
    h2 = (jnp.dot(h2.astype(bf16), w2_ref[0], preferred_element_type=jnp.float32)
          + b2_ref[0])
    x = x + h2

    x_scr[...] = x                                    # carry to next depth step

    # ---- final LayerNorm on cls/dist rows, single merged output block ----
    @pl.when(d == pl.num_programs(1) - 1)
    def _finalize():
        y = _layernorm(x[0:2, :], normg_ref[...], normb_ref[...])
        out_ref[0] = y                                # (2, D)


# ---------------- full forward (wrapper) ----------------
def vit_feature_extractor(x, params):
    # x: (B, C, H, W) NCHW float32 (same as the PyTorch Conv2d patch-embed input)
    B, C, H, W = x.shape
    P = PATCH
    Hp, Wp = H // P, W // P
    # Non-overlapping stride==kernel conv == patchify + matmul.
    # Patch feature order is (c, ph, pw) to match torch Conv2d weight flattening.
    patches = (x.reshape(B, C, Hp, P, Wp, P)
               .transpose(0, 2, 4, 1, 3, 5)
               .reshape(B, Hp * Wp, C * P * P)).astype(jnp.bfloat16)
    N, Kp = patches.shape[1], patches.shape[2]
    D = EMBED_DIM
    Dm = MLP_RATIO * D
    S = SEQ

    # weights -> bf16 (halves HBM traffic / VMEM footprint, 2x MXU); biases/LN/pos stay f32
    kp = {k: (v.astype(jnp.bfloat16) if k in _BF16_WEIGHT_KEYS else v)
          for k, v in params.items()}

    def cspec(shape):          # grid-constant operand (DMA'd once)
        nd = len(shape)
        return pl.BlockSpec(shape, lambda i, d, _nd=nd: (0,) * _nd)

    def lspec(shape):          # per-layer operand, streamed along the depth grid axis
        nd = len(shape)
        return pl.BlockSpec((1,) + tuple(shape), lambda i, d, _nd=nd: (d,) + (0,) * _nd)

    kernel = functools.partial(_vit_block_kernel, num_heads=NUM_HEADS)
    out = pl.pallas_call(
        kernel,
        out_shape=jax.ShapeDtypeStruct((B, 2, D), jnp.float32),
        grid=(B, DEPTH),
        in_specs=[
            pl.BlockSpec((1, N, Kp), lambda i, d: (i, 0, 0)),   # per-batch patches
            cspec((Kp, D)), cspec((1, D)),                      # patch-embed w / b
            cspec((1, D)), cspec((1, D)),                       # cls / dist tokens
            cspec((S, D)),                                      # pos embed
            lspec((1, D)), lspec((1, D)),                       # ln1 gamma / beta
            lspec((D, D)), lspec((1, D)),                       # wq / bq
            lspec((D, D)), lspec((1, D)),                       # wk / bk
            lspec((D, D)), lspec((1, D)),                       # wv / bv
            lspec((D, D)), lspec((1, D)),                       # wproj / bproj
            lspec((1, D)), lspec((1, D)),                       # ln2 gamma / beta
            lspec((D, Dm)), lspec((1, Dm)),                     # fc1
            lspec((Dm, D)), lspec((1, D)),                      # fc2
            cspec((1, D)), cspec((1, D)),                       # final norm gamma / beta
        ],
        out_specs=pl.BlockSpec((1, 2, D), lambda i, d: (i, 0, 0)),
        scratch_shapes=[pltpu.VMEM((S, D), jnp.float32)],       # activation carried over depth
        compiler_params=pltpu.CompilerParams(
            dimension_semantics=("parallel", "arbitrary"),       # batch parallel, depth serial
            vmem_limit_bytes=32 * 1024 * 1024),
    )(patches, kp["patch_w"], kp["patch_b"],
      kp["cls_token"], kp["dist_token"], kp["pos_embed"],
      kp["ln1_g"], kp["ln1_b"],
      kp["wq"], kp["bq"], kp["wk"], kp["bk"], kp["wv"], kp["bv"],
      kp["wproj"], kp["bproj"],
      kp["ln2_g"], kp["ln2_b"],
      kp["w1"], kp["b1"], kp["w2"], kp["b2"],
      kp["norm_g"], kp["norm_b"])
    # pos_drop / attn_drop / drop_path are identity at inference.
    return out[:, 0, :], out[:, 1, :]


# ---------------- pure-JAX reference (same numerics, no Pallas) ----------------
def _ref_gelu(x):
    return 0.5 * x * (1.0 + jax.lax.erf(x * 0.7071067811865476))


def ref_forward(x, params):
    bf = jnp.bfloat16

    def wdot(a, w):
        return jnp.dot(a.astype(bf), w.astype(bf), preferred_element_type=jnp.float32)

    B, C, H, W = x.shape
    P = PATCH
    Hp, Wp = H // P, W // P
    patches = (x.reshape(B, C, Hp, P, Wp, P)
               .transpose(0, 2, 4, 1, 3, 5)
               .reshape(B, Hp * Wp, C * P * P))
    tok = wdot(patches, params["patch_w"]) + params["patch_b"]
    D = EMBED_DIM
    cls = jnp.broadcast_to(params["cls_token"][None], (B, 1, D))
    dist = jnp.broadcast_to(params["dist_token"][None], (B, 1, D))
    seq = jnp.concatenate([cls, dist, tok], axis=1) + params["pos_embed"][None]
    dh = D // NUM_HEADS
    scale = float(dh) ** -0.5
    for d in range(DEPTH):
        h = _layernorm(seq, params["ln1_g"][d], params["ln1_b"][d])
        q = (wdot(h, params["wq"][d]) + params["bq"][d]) * scale
        k = wdot(h, params["wk"][d]) + params["bk"][d]
        v = wdot(h, params["wv"][d]) + params["bv"][d]
        Bq, S, _ = q.shape
        qh = q.reshape(Bq, S, NUM_HEADS, dh).transpose(0, 2, 1, 3).astype(bf)
        kh = k.reshape(Bq, S, NUM_HEADS, dh).transpose(0, 2, 1, 3).astype(bf)
        vh = v.reshape(Bq, S, NUM_HEADS, dh).transpose(0, 2, 1, 3).astype(bf)
        s = jnp.einsum("bhqd,bhkd->bhqk", qh, kh, preferred_element_type=jnp.float32)
        s = s - jnp.max(s, axis=-1, keepdims=True)
        p = jnp.exp(s)
        p = p / jnp.sum(p, axis=-1, keepdims=True)
        o = jnp.einsum("bhqk,bhkd->bhqd", p.astype(bf), vh,
                       preferred_element_type=jnp.float32)
        o = o.transpose(0, 2, 1, 3).reshape(Bq, S, D)
        seq = seq + wdot(o, params["wproj"][d]) + params["bproj"][d]
        h2 = _layernorm(seq, params["ln2_g"][d], params["ln2_b"][d])
        h2 = _ref_gelu(wdot(h2, params["w1"][d]) + params["b1"][d])
        seq = seq + wdot(h2, params["w2"][d]) + params["b2"][d]
    seq = _layernorm(seq, params["norm_g"], params["norm_b"])
    return seq[:, 0], seq[:, 1]


# ---------------- deterministic parameter init ----------------
def init_params(key):
    D = EMBED_DIM
    Kp = IN_CHANS * PATCH * PATCH
    Dm = MLP_RATIO * D
    keys = iter(jax.random.split(key, 24))

    def rnd(shape, std=0.02):
        return (std * jax.random.normal(next(keys), shape)).astype(jnp.float32)

    return {
        "patch_w": rnd((Kp, D)),                    # conv weight reshaped (C*P*P, D)
        "patch_b": rnd((1, D)),
        "cls_token": rnd((1, D)),
        "dist_token": rnd((1, D)),
        "pos_embed": rnd((SEQ, D)),
        "norm_g": jnp.ones((1, D), jnp.float32),
        "norm_b": jnp.zeros((1, D), jnp.float32),
        # per-block parameters stacked along a leading DEPTH axis (streamed per layer)
        "ln1_g": jnp.ones((DEPTH, 1, D), jnp.float32),
        "ln1_b": jnp.zeros((DEPTH, 1, D), jnp.float32),
        "wq": rnd((DEPTH, D, D)), "bq": rnd((DEPTH, 1, D)),
        "wk": rnd((DEPTH, D, D)), "bk": rnd((DEPTH, 1, D)),
        "wv": rnd((DEPTH, D, D)), "bv": rnd((DEPTH, 1, D)),
        "wproj": rnd((DEPTH, D, D)), "bproj": rnd((DEPTH, 1, D)),
        "ln2_g": jnp.ones((DEPTH, 1, D), jnp.float32),
        "ln2_b": jnp.zeros((DEPTH, 1, D), jnp.float32),
        "w1": rnd((DEPTH, D, Dm)), "b1": rnd((DEPTH, 1, Dm)),
        "w2": rnd((DEPTH, Dm, D)), "b2": rnd((DEPTH, 1, D)),
    }


if __name__ == "__main__":
    key = jax.random.PRNGKey(0)
    pkey, xkey = jax.random.split(key)
    params = init_params(pkey)
    x = jax.random.normal(xkey, (2, IN_CHANS, IMG, IMG), dtype=jnp.float32)

    x_cls, x_dist = jax.jit(vit_feature_extractor)(x, params)
    jax.block_until_ready((x_cls, x_dist))

    r_cls, r_dist = ref_forward(x, params)
    # Kernel and reference use identical bf16 cast points / f32 accumulation; residual
    # mismatch is accumulation-order noise plus the 1.5e-7 in-kernel erf approximation.
    np.testing.assert_allclose(np.asarray(x_cls), np.asarray(r_cls), rtol=5e-3, atol=5e-3)
    np.testing.assert_allclose(np.asarray(x_dist), np.asarray(r_dist), rtol=5e-3, atol=5e-3)
    assert x_cls.shape == (2, EMBED_DIM) and x_dist.shape == (2, EMBED_DIM)
    print("KERNEL_OK")
</pallas_src>

<mosaic_0001>
module attributes {stable_mosaic.version = 11 : i64} {
  func.func @_vit_block_kernel(%arg0: i32, %arg1: i32, %arg2: memref<1x4x768xbf16, #tpu.memory_space<vmem>>, %arg3: memref<768x32xbf16, #tpu.memory_space<vmem>>, %arg4: memref<1x32xf32, #tpu.memory_space<vmem>>, %arg5: memref<1x32xf32, #tpu.memory_space<vmem>>, %arg6: memref<1x32xf32, #tpu.memory_space<vmem>>, %arg7: memref<6x32xf32, #tpu.memory_space<vmem>>, %arg8: memref<1x1x32xf32, #tpu.memory_space<vmem>>, %arg9: memref<1x1x32xf32, #tpu.memory_space<vmem>>, %arg10: memref<1x32x32xbf16, #tpu.memory_space<vmem>>, %arg11: memref<1x1x32xf32, #tpu.memory_space<vmem>>, %arg12: memref<1x32x32xbf16, #tpu.memory_space<vmem>>, %arg13: memref<1x1x32xf32, #tpu.memory_space<vmem>>, %arg14: memref<1x32x32xbf16, #tpu.memory_space<vmem>>, %arg15: memref<1x1x32xf32, #tpu.memory_space<vmem>>, %arg16: memref<1x32x32xbf16, #tpu.memory_space<vmem>>, %arg17: memref<1x1x32xf32, #tpu.memory_space<vmem>>, %arg18: memref<1x1x32xf32, #tpu.memory_space<vmem>>, %arg19: memref<1x1x32xf32, #tpu.memory_space<vmem>>, %arg20: memref<1x32x128xbf16, #tpu.memory_space<vmem>>, %arg21: memref<1x1x128xf32, #tpu.memory_space<vmem>>, %arg22: memref<1x128x32xbf16, #tpu.memory_space<vmem>>, %arg23: memref<1x1x32xf32, #tpu.memory_space<vmem>>, %arg24: memref<1x32xf32, #tpu.memory_space<vmem>>, %arg25: memref<1x32xf32, #tpu.memory_space<vmem>>, %arg26: memref<1x2x32xf32, #tpu.memory_space<vmem>>, %arg27: memref<6x32xf32, #tpu.memory_space<vmem>>) attributes {dimension_semantics = [#tpu.dimension_semantics<parallel>, #tpu.dimension_semantics<arbitrary>], iteration_bounds = array<i64: 2, 2>, scalar_prefetch = 0 : i64, scratch_operands = 1 : i64, tpu.core_type = #tpu.core_type<tc>, window_params = [{transform_indices = @transform_0, window_bounds = array<i64: 1, 4, 768>}, {pipeline_mode = #tpu.pipeline_mode<synchronous>, transform_indices = @transform_1, window_bounds = array<i64: 768, 32>}, {pipeline_mode = #tpu.pipeline_mode<synchronous>, transform_indices = @transform_2, window_bounds = array<i64: 1, 32>}, {pipeline_mode = #tpu.pipeline_mode<synchronous>, transform_indices = @transform_3, window_bounds = array<i64: 1, 32>}, {pipeline_mode = #tpu.pipeline_mode<synchronous>, transform_indices = @transform_4, window_bounds = array<i64: 1, 32>}, {pipeline_mode = #tpu.pipeline_mode<synchronous>, transform_indices = @transform_5, window_bounds = array<i64: 6, 32>}, {transform_indices = @transform_6, window_bounds = array<i64: 1, 1, 32>}, {transform_indices = @transform_7, window_bounds = array<i64: 1, 1, 32>}, {transform_indices = @transform_8, window_bounds = array<i64: 1, 32, 32>}, {transform_indices = @transform_9, window_bounds = array<i64: 1, 1, 32>}, {transform_indices = @transform_10, window_bounds = array<i64: 1, 32, 32>}, {transform_indices = @transform_11, window_bounds = array<i64: 1, 1, 32>}, {transform_indices = @transform_12, window_bounds = array<i64: 1, 32, 32>}, {transform_indices = @transform_13, window_bounds = array<i64: 1, 1, 32>}, {transform_indices = @transform_14, window_bounds = array<i64: 1, 32, 32>}, {transform_indices = @transform_15, window_bounds = array<i64: 1, 1, 32>}, {transform_indices = @transform_16, window_bounds = array<i64: 1, 1, 32>}, {transform_indices = @transform_17, window_bounds = array<i64: 1, 1, 32>}, {transform_indices = @transform_18, window_bounds = array<i64: 1, 32, 128>}, {transform_indices = @transform_19, window_bounds = array<i64: 1, 1, 128>}, {transform_indices = @transform_20, window_bounds = array<i64: 1, 128, 32>}, {transform_indices = @transform_21, window_bounds = array<i64: 1, 1, 32>}, {pipeline_mode = #tpu.pipeline_mode<synchronous>, transform_indices = @transform_22, window_bounds = array<i64: 1, 32>}, {pipeline_mode = #tpu.pipeline_mode<synchronous>, transform_indices = @transform_23, window_bounds = array<i64: 1, 32>}, {transform_indices = @transform_24, window_bounds = array<i64: 1, 2, 32>}]} {
    %c0_i32 = arith.constant 0 : i32
    %0 = arith.cmpi eq, %arg1, %c0_i32 : i32
    %1 = arith.extui %0 : i1 to i32
    %c0_i32_0 = arith.constant 0 : i32
    %2 = arith.cmpi ne, %1, %c0_i32_0 : i32
    scf.if %2 {
      %c0_104 = arith.constant 0 : index
      %c0_105 = arith.constant 0 : index
      %c0_106 = arith.constant 0 : index
      %233 = vector.load %arg2[%c0_104, %c0_105, %c0_106] : memref<1x4x768xbf16, #tpu.memory_space<vmem>>, vector<1x4x768xbf16>
      %234 = vector.shape_cast %233 : vector<1x4x768xbf16> to vector<4x768xbf16>
      %c0_107 = arith.constant 0 : index
      %c0_108 = arith.constant 0 : index
      %235 = vector.load %arg3[%c0_107, %c0_108] : memref<768x32xbf16, #tpu.memory_space<vmem>>, vector<768x32xbf16>
      %cst_109 = arith.constant dense<0.000000e+00> : vector<4x32xf32>
      %236 = tpu.matmul %234, %235, %cst_109 {dimension_numbers = #tpu.dot_dimension_numbers<[1], [0], [0], [1], [0, 0, 1, 1], [], []>} : vector<4x768xbf16>, vector<768x32xbf16>, vector<4x32xf32> -> vector<4x32xf32>
      %c0_110 = arith.constant 0 : index
      %c0_111 = arith.constant 0 : index
      %237 = vector.load %arg4[%c0_110, %c0_111] : memref<1x32xf32, #tpu.memory_space<vmem>>, vector<1x32xf32>
      %238 = vector.broadcast %237 : vector<1x32xf32> to vector<4x32xf32>
      %239 = arith.addf %236, %238 : vector<4x32xf32>
      %c0_112 = arith.constant 0 : index
      %c0_113 = arith.constant 0 : index
      %240 = vector.load %arg5[%c0_112, %c0_113] : memref<1x32xf32, #tpu.memory_space<vmem>>, vector<1x32xf32>
      %c0_114 = arith.constant 0 : index
      %c0_115 = arith.constant 0 : index
      %241 = vector.load %arg6[%c0_114, %c0_115] : memref<1x32xf32, #tpu.memory_space<vmem>>, vector<1x32xf32>
      %242 = tpu.concatenate %240, %241, %239 in 0 : vector<1x32xf32>, vector<1x32xf32>, vector<4x32xf32> -> vector<6x32xf32>
      %c0_116 = arith.constant 0 : index
      %c0_117 = arith.constant 0 : index
      %243 = vector.load %arg7[%c0_116, %c0_117] : memref<6x32xf32, #tpu.memory_space<vmem>>, vector<6x32xf32>
      %244 = arith.addf %242, %243 : vector<6x32xf32>
      %c0_118 = arith.constant 0 : index
      %c0_119 = arith.constant 0 : index
      %245 = vector.load %arg27[%c0_118, %c0_119] : memref<6x32xf32, #tpu.memory_space<vmem>>, vector<6x32xf32>
      tpu.vector_store %arg27[%c0_118, %c0_119], %244 {strides = array<i32>} : memref<6x32xf32, #tpu.memory_space<vmem>>, vector<6x32xf32>,
    } else {
    }
    %c0 = arith.constant 0 : index
    %c0_1 = arith.constant 0 : index
    %3 = vector.load %arg27[%c0, %c0_1] : memref<6x32xf32, #tpu.memory_space<vmem>>, vector<6x32xf32>
    %c0_2 = arith.constant 0 : index
    %c0_3 = arith.constant 0 : index
    %c0_4 = arith.constant 0 : index
    %4 = vector.load %arg8[%c0_2, %c0_3, %c0_4] : memref<1x1x32xf32, #tpu.memory_space<vmem>>, vector<1x1x32xf32>
    %5 = vector.shape_cast %4 : vector<1x1x32xf32> to vector<1x32xf32>
    %c0_5 = arith.constant 0 : index
    %c0_6 = arith.constant 0 : index
    %c0_7 = arith.constant 0 : index
    %6 = vector.load %arg9[%c0_5, %c0_6, %c0_7] : memref<1x1x32xf32, #tpu.memory_space<vmem>>, vector<1x1x32xf32>
    %7 = vector.shape_cast %6 : vector<1x1x32xf32> to vector<1x32xf32>
    %cst = arith.constant dense<0.000000e+00> : vector<6xf32>
    %8 = vector.multi_reduction <add>, %3, %cst [1] : vector<6x32xf32> to vector<6xf32>
    %9 = vector.shape_cast %8 : vector<6xf32> to vector<6x1xf32>
    %cst_8 = arith.constant 3.200000e+01 : f32
    %10 = vector.broadcast %cst_8 : f32 to vector<6x1xf32>
    %11 = arith.divf %9, %10 : vector<6x1xf32>
    %12 = vector.broadcast %11 : vector<6x1xf32> to vector<6x32xf32>
    %13 = arith.subf %3, %12 : vector<6x32xf32>
    %14 = arith.mulf %13, %13 : vector<6x32xf32>
    %cst_9 = arith.constant dense<0.000000e+00> : vector<6xf32>
    %15 = vector.multi_reduction <add>, %14, %cst_9 [1] : vector<6x32xf32> to vector<6xf32>
    %16 = vector.shape_cast %15 : vector<6xf32> to vector<6x1xf32>
    %cst_10 = arith.constant 3.200000e+01 : f32
    %17 = vector.broadcast %cst_10 : f32 to vector<6x1xf32>
    %18 = arith.divf %16, %17 : vector<6x1xf32>
    %cst_11 = arith.constant 9.99999997E-7 : f32
    %19 = vector.broadcast %cst_11 : f32 to vector<6x1xf32>
    %20 = arith.addf %18, %19 : vector<6x1xf32>
    %21 = math.rsqrt %20 : vector<6x1xf32>
    %22 = vector.broadcast %21 : vector<6x1xf32> to vector<6x32xf32>
    %23 = arith.mulf %13, %22 : vector<6x32xf32>
    %24 = vector.broadcast %5 : vector<1x32xf32> to vector<6x32xf32>
    %25 = arith.mulf %23, %24 : vector<6x32xf32>
    %26 = vector.broadcast %7 : vector<1x32xf32> to vector<6x32xf32>
    %27 = arith.addf %25, %26 : vector<6x32xf32>
    %28 = arith.truncf %27 : vector<6x32xf32> to vector<6x32xbf16>
    %c0_12 = arith.constant 0 : index
    %c0_13 = arith.constant 0 : index
    %c0_14 = arith.constant 0 : index
    %29 = vector.load %arg10[%c0_12, %c0_13, %c0_14] : memref<1x32x32xbf16, #tpu.memory_space<vmem>>, vector<1x32x32xbf16>
    %30 = vector.shape_cast %29 : vector<1x32x32xbf16> to vector<32x32xbf16>
    %cst_15 = arith.constant dense<0.000000e+00> : vector<6x32xf32>
    %31 = tpu.matmul %28, %30, %cst_15 {dimension_numbers = #tpu.dot_dimension_numbers<[1], [0], [0], [1], [0, 0, 1, 1], [], []>} : vector<6x32xbf16>, vector<32x32xbf16>, vector<6x32xf32> -> vector<6x32xf32>
    %c0_16 = arith.constant 0 : index
    %c0_17 = arith.constant 0 : index
    %c0_18 = arith.constant 0 : index
    %32 = vector.load %arg11[%c0_16, %c0_17, %c0_18] : memref<1x1x32xf32, #tpu.memory_space<vmem>>, vector<1x1x32xf32>
    %33 = vector.shape_cast %32 : vector<1x1x32xf32> to vector<1x32xf32>
    %34 = vector.broadcast %33 : vector<1x32xf32> to vector<6x32xf32>
    %35 = arith.addf %31, %34 : vector<6x32xf32>
    %cst_19 = arith.constant 0.353553385 : f32
    %36 = vector.broadcast %cst_19 : f32 to vector<6x32xf32>
    %37 = arith.mulf %35, %36 : vector<6x32xf32>
    %c0_20 = arith.constant 0 : index
    %c0_21 = arith.constant 0 : index
    %c0_22 = arith.constant 0 : index
    %38 = vector.load %arg12[%c0_20, %c0_21, %c0_22] : memref<1x32x32xbf16, #tpu.memory_space<vmem>>, vector<1x32x32xbf16>
    %39 = vector.shape_cast %38 : vector<1x32x32xbf16> to vector<32x32xbf16>
    %cst_23 = arith.constant dense<0.000000e+00> : vector<6x32xf32>
    %40 = tpu.matmul %28, %39, %cst_23 {dimension_numbers = #tpu.dot_dimension_numbers<[1], [0], [0], [1], [0, 0, 1, 1], [], []>} : vector<6x32xbf16>, vector<32x32xbf16>, vector<6x32xf32> -> vector<6x32xf32>
    %c0_24 = arith.constant 0 : index
    %c0_25 = arith.constant 0 : index
    %c0_26 = arith.constant 0 : index
    %41 = vector.load %arg13[%c0_24, %c0_25, %c0_26] : memref<1x1x32xf32, #tpu.memory_space<vmem>>, vector<1x1x32xf32>
    %42 = vector.shape_cast %41 : vector<1x1x32xf32> to vector<1x32xf32>
    %43 = vector.broadcast %42 : vector<1x32xf32> to vector<6x32xf32>
    %44 = arith.addf %40, %43 : vector<6x32xf32>
    %c0_27 = arith.constant 0 : index
    %c0_28 = arith.constant 0 : index
    %c0_29 = arith.constant 0 : index
    %45 = vector.load %arg14[%c0_27, %c0_28, %c0_29] : memref<1x32x32xbf16, #tpu.memory_space<vmem>>, vector<1x32x32xbf16>
    %46 = vector.shape_cast %45 : vector<1x32x32xbf16> to vector<32x32xbf16>
    %cst_30 = arith.constant dense<0.000000e+00> : vector<6x32xf32>
    %47 = tpu.matmul %28, %46, %cst_30 {dimension_numbers = #tpu.dot_dimension_numbers<[1], [0], [0], [1], [0, 0, 1, 1], [], []>} : vector<6x32xbf16>, vector<32x32xbf16>, vector<6x32xf32> -> vector<6x32xf32>
    %c0_31 = arith.constant 0 : index
    %c0_32 = arith.constant 0 : index
    %c0_33 = arith.constant 0 : index
    %48 = vector.load %arg15[%c0_31, %c0_32, %c0_33] : memref<1x1x32xf32, #tpu.memory_space<vmem>>, vector<1x1x32xf32>
    %49 = vector.shape_cast %48 : vector<1x1x32xf32> to vector<1x32xf32>
    %50 = vector.broadcast %49 : vector<1x32xf32> to vector<6x32xf32>
    %51 = arith.addf %47, %50 : vector<6x32xf32>
    %c0_34 = arith.constant 0 : index
    %c0_35 = arith.constant 0 : index
    %c0_36 = arith.constant 0 : index
    %52 = vector.load %arg16[%c0_34, %c0_35, %c0_36] : memref<1x32x32xbf16, #tpu.memory_space<vmem>>, vector<1x32x32xbf16>
    %53 = vector.shape_cast %52 : vector<1x32x32xbf16> to vector<32x32xbf16>
    %cst_37 = arith.constant 0.000000e+00 : f32
    %54 = vector.broadcast %cst_37 : f32 to vector<6x32xf32>
    %55 = vector.extract_strided_slice %37 {offsets = [0, 0], sizes = [6, 8], strides = [1, 1]} : vector<6x32xf32> to vector<6x8xf32>
    %56 = arith.truncf %55 : vector<6x8xf32> to vector<6x8xbf16>
    %57 = vector.extract_strided_slice %44 {offsets = [0, 0], sizes = [6, 8], strides = [1, 1]} : vector<6x32xf32> to vector<6x8xf32>
    %58 = arith.truncf %57 : vector<6x8xf32> to vector<6x8xbf16>
    %59 = vector.extract_strided_slice %51 {offsets = [0, 0], sizes = [6, 8], strides = [1, 1]} : vector<6x32xf32> to vector<6x8xf32>
    %60 = arith.truncf %59 : vector<6x8xf32> to vector<6x8xbf16>
    %cst_38 = arith.constant dense<0.000000e+00> : vector<6x6xf32>
    %61 = tpu.matmul %56, %58, %cst_38 {dimension_numbers = #tpu.dot_dimension_numbers<[1], [1], [0], [0], [0, 0, 1, 0], [], []>} : vector<6x8xbf16>, vector<6x8xbf16>, vector<6x6xf32> -> vector<6x6xf32>
    %cst_39 = arith.constant dense<0xFF800000> : vector<6xf32>
    %62 = vector.multi_reduction <maximumf>, %61, %cst_39 [1] : vector<6x6xf32> to vector<6xf32>
    %63 = vector.shape_cast %62 : vector<6xf32> to vector<6x1xf32>
    %64 = vector.broadcast %63 : vector<6x1xf32> to vector<6x6xf32>
    %65 = arith.subf %61, %64 : vector<6x6xf32>
    %66 = math.exp %65 : vector<6x6xf32>
    %cst_40 = arith.constant dense<0.000000e+00> : vector<6xf32>
    %67 = vector.multi_reduction <add>, %66, %cst_40 [1] : vector<6x6xf32> to vector<6xf32>
    %68 = vector.shape_cast %67 : vector<6xf32> to vector<6x1xf32>
    %69 = vector.broadcast %68 : vector<6x1xf32> to vector<6x6xf32>
    %70 = arith.divf %66, %69 : vector<6x6xf32>
    %71 = arith.truncf %70 : vector<6x6xf32> to vector<6x6xbf16>
    %cst_41 = arith.constant dense<0.000000e+00> : vector<6x8xf32>
    %72 = tpu.matmul %71, %60, %cst_41 {dimension_numbers = #tpu.dot_dimension_numbers<[1], [0], [0], [1], [0, 0, 1, 1], [], []>} : vector<6x6xbf16>, vector<6x8xbf16>, vector<6x8xf32> -> vector<6x8xf32>
    %73 = arith.truncf %72 : vector<6x8xf32> to vector<6x8xbf16>
    %74 = vector.extract_strided_slice %53 {offsets = [0, 0], sizes = [8, 32], strides = [1, 1]} : vector<32x32xbf16> to vector<8x32xbf16>
    %cst_42 = arith.constant dense<0.000000e+00> : vector<6x32xf32>
    %75 = tpu.matmul %73, %74, %cst_42 {dimension_numbers = #tpu.dot_dimension_numbers<[1], [0], [0], [1], [0, 0, 1, 1], [], []>} : vector<6x8xbf16>, vector<8x32xbf16>, vector<6x32xf32> -> vector<6x32xf32>
    %76 = arith.addf %54, %75 : vector<6x32xf32>
    %77 = vector.extract_strided_slice %37 {offsets = [0, 8], sizes = [6, 8], strides = [1, 1]} : vector<6x32xf32> to vector<6x8xf32>
    %78 = arith.truncf %77 : vector<6x8xf32> to vector<6x8xbf16>
    %79 = vector.extract_strided_slice %44 {offsets = [0, 8], sizes = [6, 8], strides = [1, 1]} : vector<6x32xf32> to vector<6x8xf32>
    %80 = arith.truncf %79 : vector<6x8xf32> to vector<6x8xbf16>
    %81 = vector.extract_strided_slice %51 {offsets = [0, 8], sizes = [6, 8], strides = [1, 1]} : vector<6x32xf32> to vector<6x8xf32>
    %82 = arith.truncf %81 : vector<6x8xf32> to vector<6x8xbf16>
    %cst_43 = arith.constant dense<0.000000e+00> : vector<6x6xf32>
    %83 = tpu.matmul %78, %80, %cst_43 {dimension_numbers = #tpu.dot_dimension_numbers<[1], [1], [0], [0], [0, 0, 1, 0], [], []>} : vector<6x8xbf16>, vector<6x8xbf16>, vector<6x6xf32> -> vector<6x6xf32>
    %cst_44 = arith.constant dense<0xFF800000> : vector<6xf32>
    %84 = vector.multi_reduction <maximumf>, %83, %cst_44 [1] : vector<6x6xf32> to vector<6xf32>
    %85 = vector.shape_cast %84 : vector<6xf32> to vector<6x1xf32>
    %86 = vector.broadcast %85 : vector<6x1xf32> to vector<6x6xf32>
    %87 = arith.subf %83, %86 : vector<6x6xf32>
    %88 = math.exp %87 : vector<6x6xf32>
    %cst_45 = arith.constant dense<0.000000e+00> : vector<6xf32>
    %89 = vector.multi_reduction <add>, %88, %cst_45 [1] : vector<6x6xf32> to vector<6xf32>
    %90 = vector.shape_cast %89 : vector<6xf32> to vector<6x1xf32>
    %91 = vector.broadcast %90 : vector<6x1xf32> to vector<6x6xf32>
    %92 = arith.divf %88, %91 : vector<6x6xf32>
    %93 = arith.truncf %92 : vector<6x6xf32> to vector<6x6xbf16>
    %cst_46 = arith.constant dense<0.000000e+00> : vector<6x8xf32>
    %94 = tpu.matmul %93, %82, %cst_46 {dimension_numbers = #tpu.dot_dimension_numbers<[1], [0], [0], [1], [0, 0, 1, 1], [], []>} : vector<6x6xbf16>, vector<6x8xbf16>, vector<6x8xf32> -> vector<6x8xf32>
    %95 = arith.truncf %94 : vector<6x8xf32> to vector<6x8xbf16>
    %96 = vector.extract_strided_slice %53 {offsets = [8, 0], sizes = [8, 32], strides = [1, 1]} : vector<32x32xbf16> to vector<8x32xbf16>
    %cst_47 = arith.constant dense<0.000000e+00> : vector<6x32xf32>
    %97 = tpu.matmul %95, %96, %cst_47 {dimension_numbers = #tpu.dot_dimension_numbers<[1], [0], [0], [1], [0, 0, 1, 1], [], []>} : vector<6x8xbf16>, vector<8x32xbf16>, vector<6x32xf32> -> vector<6x32xf32>
    %98 = arith.addf %76, %97 : vector<6x32xf32>
    %99 = vector.extract_strided_slice %37 {offsets = [0, 16], sizes = [6, 8], strides = [1, 1]} : vector<6x32xf32> to vector<6x8xf32>
    %100 = arith.truncf %99 : vector<6x8xf32> to vector<6x8xbf16>
    %101 = vector.extract_strided_slice %44 {offsets = [0, 16], sizes = [6, 8], strides = [1, 1]} : vector<6x32xf32> to vector<6x8xf32>
    %102 = arith.truncf %101 : vector<6x8xf32> to vector<6x8xbf16>
    %103 = vector.extract_strided_slice %51 {offsets = [0, 16], sizes = [6, 8], strides = [1, 1]} : vector<6x32xf32> to vector<6x8xf32>
    %104 = arith.truncf %103 : vector<6x8xf32> to vector<6x8xbf16>
    %cst_48 = arith.constant dense<0.000000e+00> : vector<6x6xf32>
    %105 = tpu.matmul %100, %102, %cst_48 {dimension_numbers = #tpu.dot_dimension_numbers<[1], [1], [0], [0], [0, 0, 1, 0], [], []>} : vector<6x8xbf16>, vector<6x8xbf16>, vector<6x6xf32> -> vector<6x6xf32>
    %cst_49 = arith.constant dense<0xFF800000> : vector<6xf32>
    %106 = vector.multi_reduction <maximumf>, %105, %cst_49 [1] : vector<6x6xf32> to vector<6xf32>
    %107 = vector.shape_cast %106 : vector<6xf32> to vector<6x1xf32>
    %108 = vector.broadcast %107 : vector<6x1xf32> to vector<6x6xf32>
    %109 = arith.subf %105, %108 : vector<6x6xf32>
    %110 = math.exp %109 : vector<6x6xf32>
    %cst_50 = arith.constant dense<0.000000e+00> : vector<6xf32>
    %111 = vector.multi_reduction <add>, %110, %cst_50 [1] : vector<6x6xf32> to vector<6xf32>
    %112 = vector.shape_cast %111 : vector<6xf32> to vector<6x1xf32>
    %113 = vector.broadcast %112 : vector<6x1xf32> to vector<6x6xf32>
    %114 = arith.divf %110, %113 : vector<6x6xf32>
    %115 = arith.truncf %114 : vector<6x6xf32> to vector<6x6xbf16>
    %cst_51 = arith.constant dense<0.000000e+00> : vector<6x8xf32>
    %116 = tpu.matmul %115, %104, %cst_51 {dimension_numbers = #tpu.dot_dimension_numbers<[1], [0], [0], [1], [0, 0, 1, 1], [], []>} : vector<6x6xbf16>, vector<6x8xbf16>, vector<6x8xf32> -> vector<6x8xf32>
    %117 = arith.truncf %116 : vector<6x8xf32> to vector<6x8xbf16>
    %118 = vector.extract_strided_slice %53 {offsets = [16, 0], sizes = [8, 32], strides = [1, 1]} : vector<32x32xbf16> to vector<8x32xbf16>
    %cst_52 = arith.constant dense<0.000000e+00> : vector<6x32xf32>
    %119 = tpu.matmul %117, %118, %cst_52 {dimension_numbers = #tpu.dot_dimension_numbers<[1], [0], [0], [1], [0, 0, 1, 1], [], []>} : vector<6x8xbf16>, vector<8x32xbf16>, vector<6x32xf32> -> vector<6x32xf32>
    %120 = arith.addf %98, %119 : vector<6x32xf32>
    %121 = vector.extract_strided_slice %37 {offsets = [0, 24], sizes = [6, 8], strides = [1, 1]} : vector<6x32xf32> to vector<6x8xf32>
    %122 = arith.truncf %121 : vector<6x8xf32> to vector<6x8xbf16>
    %123 = vector.extract_strided_slice %44 {offsets = [0, 24], sizes = [6, 8], strides = [1, 1]} : vector<6x32xf32> to vector<6x8xf32>
    %124 = arith.truncf %123 : vector<6x8xf32> to vector<6x8xbf16>
    %125 = vector.extract_strided_slice %51 {offsets = [0, 24], sizes = [6, 8], strides = [1, 1]} : vector<6x32xf32> to vector<6x8xf32>
    %126 = arith.truncf %125 : vector<6x8xf32> to vector<6x8xbf16>
    %cst_53 = arith.constant dense<0.000000e+00> : vector<6x6xf32>
    %127 = tpu.matmul %122, %124, %cst_53 {dimension_numbers = #tpu.dot_dimension_numbers<[1], [1], [0], [0], [0, 0, 1, 0], [], []>} : vector<6x8xbf16>, vector<6x8xbf16>, vector<6x6xf32> -> vector<6x6xf32>
    %cst_54 = arith.constant dense<0xFF800000> : vector<6xf32>
    %128 = vector.multi_reduction <maximumf>, %127, %cst_54 [1] : vector<6x6xf32> to vector<6xf32>
    %129 = vector.shape_cast %128 : vector<6xf32> to vector<6x1xf32>
    %130 = vector.broadcast %129 : vector<6x1xf32> to vector<6x6xf32>
    %131 = arith.subf %127, %130 : vector<6x6xf32>
    %132 = math.exp %131 : vector<6x6xf32>
    %cst_55 = arith.constant dense<0.000000e+00> : vector<6xf32>
    %133 = vector.multi_reduction <add>, %132, %cst_55 [1] : vector<6x6xf32> to vector<6xf32>
    %134 = vector.shape_cast %133 : vector<6xf32> to vector<6x1xf32>
    %135 = vector.broadcast %134 : vector<6x1xf32> to vector<6x6xf32>
    %136 = arith.divf %132, %135 : vector<6x6xf32>
    %137 = arith.truncf %136 : vector<6x6xf32> to vector<6x6xbf16>
    %cst_56 = arith.constant dense<0.000000e+00> : vector<6x8xf32>
    %138 = tpu.matmul %137, %126, %cst_56 {dimension_numbers = #tpu.dot_dimension_numbers<[1], [0], [0], [1], [0, 0, 1, 1], [], []>} : vector<6x6xbf16>, vector<6x8xbf16>, vector<6x8xf32> -> vector<6x8xf32>
    %139 = arith.truncf %138 : vector<6x8xf32> to vector<6x8xbf16>
    %140 = vector.extract_strided_slice %53 {offsets = [24, 0], sizes = [8, 32], strides = [1, 1]} : vector<32x32xbf16> to vector<8x32xbf16>
    %cst_57 = arith.constant dense<0.000000e+00> : vector<6x32xf32>
    %141 = tpu.matmul %139, %140, %cst_57 {dimension_numbers = #tpu.dot_dimension_numbers<[1], [0], [0], [1], [0, 0, 1, 1], [], []>} : vector<6x8xbf16>, vector<8x32xbf16>, vector<6x32xf32> -> vector<6x32xf32>
    %142 = arith.addf %120, %141 : vector<6x32xf32>
    %143 = arith.addf %3, %142 : vector<6x32xf32>
    %c0_58 = arith.constant 0 : index
    %c0_59 = arith.constant 0 : index
    %c0_60 = arith.constant 0 : index
    %144 = vector.load %arg17[%c0_58, %c0_59, %c0_60] : memref<1x1x32xf32, #tpu.memory_space<vmem>>, vector<1x1x32xf32>
    %145 = vector.shape_cast %144 : vector<1x1x32xf32> to vector<1x32xf32>
    %146 = vector.broadcast %145 : vector<1x32xf32> to vector<6x32xf32>
    %147 = arith.addf %143, %146 : vector<6x32xf32>
    %c0_61 = arith.constant 0 : index
    %c0_62 = arith.constant 0 : index
    %c0_63 = arith.constant 0 : index
    %148 = vector.load %arg18[%c0_61, %c0_62, %c0_63] : memref<1x1x32xf32, #tpu.memory_space<vmem>>, vector<1x1x32xf32>
    %149 = vector.shape_cast %148 : vector<1x1x32xf32> to vector<1x32xf32>
    %c0_64 = arith.constant 0 : index
    %c0_65 = arith.constant 0 : index
    %c0_66 = arith.constant 0 : index
    %150 = vector.load %arg19[%c0_64, %c0_65, %c0_66] : memref<1x1x32xf32, #tpu.memory_space<vmem>>, vector<1x1x32xf32>
    %151 = vector.shape_cast %150 : vector<1x1x32xf32> to vector<1x32xf32>
    %cst_67 = arith.constant dense<0.000000e+00> : vector<6xf32>
    %152 = vector.multi_reduction <add>, %147, %cst_67 [1] : vector<6x32xf32> to vector<6xf32>
    %153 = vector.shape_cast %152 : vector<6xf32> to vector<6x1xf32>
    %cst_68 = arith.constant 3.200000e+01 : f32
    %154 = vector.broadcast %cst_68 : f32 to vector<6x1xf32>
    %155 = arith.divf %153, %154 : vector<6x1xf32>
    %156 = vector.broadcast %155 : vector<6x1xf32> to vector<6x32xf32>
    %157 = arith.subf %147, %156 : vector<6x32xf32>
    %158 = arith.mulf %157, %157 : vector<6x32xf32>
    %cst_69 = arith.constant dense<0.000000e+00> : vector<6xf32>
    %159 = vector.multi_reduction <add>, %158, %cst_69 [1] : vector<6x32xf32> to vector<6xf32>
    %160 = vector.shape_cast %159 : vector<6xf32> to vector<6x1xf32>
    %cst_70 = arith.constant 3.200000e+01 : f32
    %161 = vector.broadcast %cst_70 : f32 to vector<6x1xf32>
    %162 = arith.divf %160, %161 : vector<6x1xf32>
    %cst_71 = arith.constant 9.99999997E-7 : f32
    %163 = vector.broadcast %cst_71 : f32 to vector<6x1xf32>
    %164 = arith.addf %162, %163 : vector<6x1xf32>
    %165 = math.rsqrt %164 : vector<6x1xf32>
    %166 = vector.broadcast %165 : vector<6x1xf32> to vector<6x32xf32>
    %167 = arith.mulf %157, %166 : vector<6x32xf32>
    %168 = vector.broadcast %149 : vector<1x32xf32> to vector<6x32xf32>
    %169 = arith.mulf %167, %168 : vector<6x32xf32>
    %170 = vector.broadcast %151 : vector<1x32xf32> to vector<6x32xf32>
    %171 = arith.addf %169, %170 : vector<6x32xf32>
    %172 = arith.truncf %171 : vector<6x32xf32> to vector<6x32xbf16>
    %c0_72 = arith.constant 0 : index
    %c0_73 = arith.constant 0 : index
    %c0_74 = arith.constant 0 : index
    %173 = vector.load %arg20[%c0_72, %c0_73, %c0_74] : memref<1x32x128xbf16, #tpu.memory_space<vmem>>, vector<1x32x128xbf16>
    %174 = vector.shape_cast %173 : vector<1x32x128xbf16> to vector<32x128xbf16>
    %cst_75 = arith.constant dense<0.000000e+00> : vector<6x128xf32>
    %175 = tpu.matmul %172, %174, %cst_75 {dimension_numbers = #tpu.dot_dimension_numbers<[1], [0], [0], [1], [0, 0, 1, 1], [], []>} : vector<6x32xbf16>, vector<32x128xbf16>, vector<6x128xf32> -> vector<6x128xf32>
    %c0_76 = arith.constant 0 : index
    %c0_77 = arith.constant 0 : index
    %c0_78 = arith.constant 0 : index
    %176 = vector.load %arg21[%c0_76, %c0_77, %c0_78] : memref<1x1x128xf32, #tpu.memory_space<vmem>>, vector<1x1x128xf32>
    %177 = vector.shape_cast %176 : vector<1x1x128xf32> to vector<1x128xf32>
    %178 = vector.broadcast %177 : vector<1x128xf32> to vector<6x128xf32>
    %179 = arith.addf %175, %178 : vector<6x128xf32>
    %cst_79 = arith.constant 5.000000e-01 : f32
    %180 = vector.broadcast %cst_79 : f32 to vector<6x128xf32>
    %181 = arith.mulf %180, %179 : vector<6x128xf32>
    %cst_80 = arith.constant 0.707106769 : f32
    %182 = vector.broadcast %cst_80 : f32 to vector<6x128xf32>
    %183 = arith.mulf %179, %182 : vector<6x128xf32>
    %184 = math.absf %183 : vector<6x128xf32>
    %cst_81 = arith.constant 0.327591091 : f32
    %185 = vector.broadcast %cst_81 : f32 to vector<6x128xf32>
    %186 = arith.mulf %185, %184 : vector<6x128xf32>
    %cst_82 = arith.constant 1.000000e+00 : f32
    %187 = vector.broadcast %cst_82 : f32 to vector<6x128xf32>
    %188 = arith.addf %187, %186 : vector<6x128xf32>
    %cst_83 = arith.constant 1.000000e+00 : f32
    %189 = vector.broadcast %cst_83 : f32 to vector<6x128xf32>
    %190 = arith.divf %189, %188 : vector<6x128xf32>
    %cst_84 = arith.constant 1.06140542 : f32
    %191 = vector.broadcast %cst_84 : f32 to vector<6x128xf32>
    %192 = arith.mulf %191, %190 : vector<6x128xf32>
    %cst_85 = arith.constant -1.45315206 : f32
    %193 = vector.broadcast %cst_85 : f32 to vector<6x128xf32>
    %194 = arith.addf %192, %193 : vector<6x128xf32>
    %195 = arith.mulf %194, %190 : vector<6x128xf32>
    %cst_86 = arith.constant 1.42141378 : f32
    %196 = vector.broadcast %cst_86 : f32 to vector<6x128xf32>
    %197 = arith.addf %195, %196 : vector<6x128xf32>
    %198 = arith.mulf %197, %190 : vector<6x128xf32>
    %cst_87 = arith.constant -0.284496725 : f32
    %199 = vector.broadcast %cst_87 : f32 to vector<6x128xf32>
    %200 = arith.addf %198, %199 : vector<6x128xf32>
    %201 = arith.mulf %200, %190 : vector<6x128xf32>
    %cst_88 = arith.constant 0.254829586 : f32
    %202 = vector.broadcast %cst_88 : f32 to vector<6x128xf32>
    %203 = arith.addf %201, %202 : vector<6x128xf32>
    %204 = arith.mulf %203, %190 : vector<6x128xf32>
    %cst_89 = arith.constant 0.000000e+00 : f32
    %205 = vector.broadcast %cst_89 : f32 to vector<6x128xf32>
    %206 = arith.subf %205, %184 : vector<6x128xf32>
    %207 = arith.mulf %206, %184 : vector<6x128xf32>
    %208 = math.exp %207 : vector<6x128xf32>
    %209 = arith.mulf %204, %208 : vector<6x128xf32>
    %cst_90 = arith.constant 1.000000e+00 : f32
    %210 = vector.broadcast %cst_90 : f32 to vector<6x128xf32>
    %211 = arith.subf %210, %209 : vector<6x128xf32>
    %cst_91 = arith.constant 0.000000e+00 : f32
    %212 = vector.broadcast %cst_91 : f32 to vector<6x128xf32>
    %213 = arith.cmpf oge, %183, %212 : vector<6x128xf32>
    %cst_92 = arith.constant 0.000000e+00 : f32
    %214 = vector.broadcast %cst_92 : f32 to vector<6x128xf32>
    %215 = arith.subf %214, %211 : vector<6x128xf32>
    %216 = arith.select %213, %211, %215 : vector<6x128xi1>, vector<6x128xf32>
    %cst_93 = arith.constant 1.000000e+00 : f32
    %217 = vector.broadcast %cst_93 : f32 to vector<6x128xf32>
    %218 = arith.addf %217, %216 : vector<6x128xf32>
    %219 = arith.mulf %181, %218 : vector<6x128xf32>
    %220 = arith.truncf %219 : vector<6x128xf32> to vector<6x128xbf16>
    %c0_94 = arith.constant 0 : index
    %c0_95 = arith.constant 0 : index
    %c0_96 = arith.constant 0 : index
    %221 = vector.load %arg22[%c0_94, %c0_95, %c0_96] : memref<1x128x32xbf16, #tpu.memory_space<vmem>>, vector<1x128x32xbf16>
    %222 = vector.shape_cast %221 : vector<1x128x32xbf16> to vector<128x32xbf16>
    %cst_97 = arith.constant dense<0.000000e+00> : vector<6x32xf32>
    %223 = tpu.matmul %220, %222, %cst_97 {dimension_numbers = #tpu.dot_dimension_numbers<[1], [0], [0], [1], [0, 0, 1, 1], [], []>} : vector<6x128xbf16>, vector<128x32xbf16>, vector<6x32xf32> -> vector<6x32xf32>
    %c0_98 = arith.constant 0 : index
    %c0_99 = arith.constant 0 : index
    %c0_100 = arith.constant 0 : index
    %224 = vector.load %arg23[%c0_98, %c0_99, %c0_100] : memref<1x1x32xf32, #tpu.memory_space<vmem>>, vector<1x1x32xf32>
    %225 = vector.shape_cast %224 : vector<1x1x32xf32> to vector<1x32xf32>
    %226 = vector.broadcast %225 : vector<1x32xf32> to vector<6x32xf32>
    %227 = arith.addf %223, %226 : vector<6x32xf32>
    %228 = arith.addf %147, %227 : vector<6x32xf32>
    %c0_101 = arith.constant 0 : index
    %c0_102 = arith.constant 0 : index
    %229 = vector.load %arg27[%c0_101, %c0_102] : memref<6x32xf32, #tpu.memory_space<vmem>>, vector<6x32xf32>
    tpu.vector_store %arg27[%c0_101, %c0_102], %228 {strides = array<i32>} : memref<6x32xf32, #tpu.memory_space<vmem>>, vector<6x32xf32>,
    %c1_i32 = arith.constant 1 : i32
    %230 = arith.cmpi eq, %arg1, %c1_i32 : i32
    %231 = arith.extui %230 : i1 to i32
    %c0_i32_103 = arith.constant 0 : i32
    %232 = arith.cmpi ne, %231, %c0_i32_103 : i32
    scf.if %232 {
      %233 = vector.extract_strided_slice %228 {offsets = [0, 0], sizes = [2, 32], strides = [1, 1]} : vector<6x32xf32> to vector<2x32xf32>
      %c0_104 = arith.constant 0 : index
      %c0_105 = arith.constant 0 : index
      %234 = vector.load %arg24[%c0_104, %c0_105] : memref<1x32xf32, #tpu.memory_space<vmem>>, vector<1x32xf32>
      %c0_106 = arith.constant 0 : index
      %c0_107 = arith.constant 0 : index
      %235 = vector.load %arg25[%c0_106, %c0_107] : memref<1x32xf32, #tpu.memory_space<vmem>>, vector<1x32xf32>
      %cst_108 = arith.constant dense<0.000000e+00> : vector<2xf32>
      %236 = vector.multi_reduction <add>, %233, %cst_108 [1] : vector<2x32xf32> to vector<2xf32>
      %237 = vector.shape_cast %236 : vector<2xf32> to vector<2x1xf32>
      %cst_109 = arith.constant 3.200000e+01 : f32
      %238 = vector.broadcast %cst_109 : f32 to vector<2x1xf32>
      %239 = arith.divf %237, %238 : vector<2x1xf32>
      %240 = vector.broadcast %239 : vector<2x1xf32> to vector<2x32xf32>
      %241 = arith.subf %233, %240 : vector<2x32xf32>
      %242 = arith.mulf %241, %241 : vector<2x32xf32>
      %cst_110 = arith.constant dense<0.000000e+00> : vector<2xf32>
      %243 = vector.multi_reduction <add>, %242, %cst_110 [1] : vector<2x32xf32> to vector<2xf32>
      %244 = vector.shape_cast %243 : vector<2xf32> to vector<2x1xf32>
      %cst_111 = arith.constant 3.200000e+01 : f32
      %245 = vector.broadcast %cst_111 : f32 to vector<2x1xf32>
      %246 = arith.divf %244, %245 : vector<2x1xf32>
      %cst_112 = arith.constant 9.99999997E-7 : f32
      %247 = vector.broadcast %cst_112 : f32 to vector<2x1xf32>
      %248 = arith.addf %246, %247 : vector<2x1xf32>
      %249 = math.rsqrt %248 : vector<2x1xf32>
      %250 = vector.broadcast %249 : vector<2x1xf32> to vector<2x32xf32>
      %251 = arith.mulf %241, %250 : vector<2x32xf32>
      %252 = vector.broadcast %234 : vector<1x32xf32> to vector<2x32xf32>
      %253 = arith.mulf %251, %252 : vector<2x32xf32>
      %254 = vector.broadcast %235 : vector<1x32xf32> to vector<2x32xf32>
      %255 = arith.addf %253, %254 : vector<2x32xf32>
      %c0_113 = arith.constant 0 : index
      %c0_114 = arith.constant 0 : index
      %c0_115 = arith.constant 0 : index
      %256 = vector.load %arg26[%c0_113, %c0_114, %c0_115] : memref<1x2x32xf32, #tpu.memory_space<vmem>>, vector<1x2x32xf32>
      %257 = vector.shape_cast %256 : vector<1x2x32xf32> to vector<2x32xf32>
      %258 = vector.shape_cast %255 : vector<2x32xf32> to vector<1x2x32xf32>
      tpu.vector_store %arg26[%c0_113, %c0_114, %c0_115], %258 {strides = array<i32>} : memref<1x2x32xf32, #tpu.memory_space<vmem>>, vector<1x2x32xf32>,
    } else {
    }
    return
  }
  func.func @transform_0(%arg0: i32, %arg1: i32) -> (i32, i32, i32) {
    %c0_i32 = arith.constant 0 : i32
    %c0_i32_0 = arith.constant 0 : i32
    %c0_i32_1 = arith.constant 0 : i32
    return %arg0, %c0_i32, %c0_i32_0 : i32, i32, i32
  }
  func.func @transform_1(%arg0: i32, %arg1: i32) -> (i32, i32) {
    %c0_i32 = arith.constant 0 : i32
    %c0_i32_0 = arith.constant 0 : i32
    %c0_i32_1 = arith.constant 0 : i32
    return %c0_i32, %c0_i32_0 : i32, i32
  }
  func.func @transform_2(%arg0: i32, %arg1: i32) -> (i32, i32) {
    %c0_i32 = arith.constant 0 : i32
    %c0_i32_0 = arith.constant 0 : i32
    %c0_i32_1 = arith.constant 0 : i32
    return %c0_i32, %c0_i32_0 : i32, i32
  }
  func.func @transform_3(%arg0: i32, %arg1: i32) -> (i32, i32) {
    %c0_i32 = arith.constant 0 : i32
    %c0_i32_0 = arith.constant 0 : i32
    %c0_i32_1 = arith.constant 0 : i32
    return %c0_i32, %c0_i32_0 : i32, i32
  }
  func.func @transform_4(%arg0: i32, %arg1: i32) -> (i32, i32) {
    %c0_i32 = arith.constant 0 : i32
    %c0_i32_0 = arith.constant 0 : i32
    %c0_i32_1 = arith.constant 0 : i32
    return %c0_i32, %c0_i32_0 : i32, i32
  }
  func.func @transform_5(%arg0: i32, %arg1: i32) -> (i32, i32) {
    %c0_i32 = arith.constant 0 : i32
    %c0_i32_0 = arith.constant 0 : i32
    %c0_i32_1 = arith.constant 0 : i32
    return %c0_i32, %c0_i32_0 : i32, i32
  }
  func.func @transform_6(%arg0: i32, %arg1: i32) -> (i32, i32, i32) {
    %c0_i32 = arith.constant 0 : i32
    %c0_i32_0 = arith.constant 0 : i32
    %c0_i32_1 = arith.constant 0 : i32
    return %arg1, %c0_i32, %c0_i32_0 : i32, i32, i32
  }
  func.func @transform_7(%arg0: i32, %arg1: i32) -> (i32, i32, i32) {
    %c0_i32 = arith.constant 0 : i32
    %c0_i32_0 = arith.constant 0 : i32
    %c0_i32_1 = arith.constant 0 : i32
    return %arg1, %c0_i32, %c0_i32_0 : i32, i32, i32
  }
  func.func @transform_8(%arg0: i32, %arg1: i32) -> (i32, i32, i32) {
    %c0_i32 = arith.constant 0 : i32
    %c0_i32_0 = arith.constant 0 : i32
    %c0_i32_1 = arith.constant 0 : i32
    return %arg1, %c0_i32, %c0_i32_0 : i32, i32, i32
  }
  func.func @transform_9(%arg0: i32, %arg1: i32) -> (i32, i32, i32) {
    %c0_i32 = arith.constant 0 : i32
    %c0_i32_0 = arith.constant 0 : i32
    %c0_i32_1 = arith.constant 0 : i32
    return %arg1, %c0_i32, %c0_i32_0 : i32, i32, i32
  }
  func.func @transform_10(%arg0: i32, %arg1: i32) -> (i32, i32, i32) {
    %c0_i32 = arith.constant 0 : i32
    %c0_i32_0 = arith.constant 0 : i32
    %c0_i32_1 = arith.constant 0 : i32
    return %arg1, %c0_i32, %c0_i32_0 : i32, i32, i32
  }
  func.func @transform_11(%arg0: i32, %arg1: i32) -> (i32, i32, i32) {
    %c0_i32 = arith.constant 0 : i32
    %c0_i32_0 = arith.constant 0 : i32
    %c0_i32_1 = arith.constant 0 : i32
    return %arg1, %c0_i32, %c0_i32_0 : i32, i32, i32
  }
  func.func @transform_12(%arg0: i32, %arg1: i32) -> (i32, i32, i32) {
    %c0_i32 = arith.constant 0 : i32
    %c0_i32_0 = arith.constant 0 : i32
    %c0_i32_1 = arith.constant 0 : i32
    return %arg1, %c0_i32, %c0_i32_0 : i32, i32, i32
  }
  func.func @transform_13(%arg0: i32, %arg1: i32) -> (i32, i32, i32) {
    %c0_i32 = arith.constant 0 : i32
    %c0_i32_0 = arith.constant 0 : i32
    %c0_i32_1 = arith.constant 0 : i32
    return %arg1, %c0_i32, %c0_i32_0 : i32, i32, i32
  }
  func.func @transform_14(%arg0: i32, %arg1: i32) -> (i32, i32, i32) {
    %c0_i32 = arith.constant 0 : i32
    %c0_i32_0 = arith.constant 0 : i32
    %c0_i32_1 = arith.constant 0 : i32
    return %arg1, %c0_i32, %c0_i32_0 : i32, i32, i32
  }
  func.func @transform_15(%arg0: i32, %arg1: i32) -> (i32, i32, i32) {
    %c0_i32 = arith.constant 0 : i32
    %c0_i32_0 = arith.constant 0 : i32
    %c0_i32_1 = arith.constant 0 : i32
    return %arg1, %c0_i32, %c0_i32_0 : i32, i32, i32
  }
  func.func @transform_16(%arg0: i32, %arg1: i32) -> (i32, i32, i32) {
    %c0_i32 = arith.constant 0 : i32
    %c0_i32_0 = arith.constant 0 : i32
    %c0_i32_1 = arith.constant 0 : i32
    return %arg1, %c0_i32, %c0_i32_0 : i32, i32, i32
  }
  func.func @transform_17(%arg0: i32, %arg1: i32) -> (i32, i32, i32) {
    %c0_i32 = arith.constant 0 : i32
    %c0_i32_0 = arith.constant 0 : i32
    %c0_i32_1 = arith.constant 0 : i32
    return %arg1, %c0_i32, %c0_i32_0 : i32, i32, i32
  }
  func.func @transform_18(%arg0: i32, %arg1: i32) -> (i32, i32, i32) {
    %c0_i32 = arith.constant 0 : i32
    %c0_i32_0 = arith.constant 0 : i32
    %c0_i32_1 = arith.constant 0 : i32
    return %arg1, %c0_i32, %c0_i32_0 : i32, i32, i32
  }
  func.func @transform_19(%arg0: i32, %arg1: i32) -> (i32, i32, i32) {
    %c0_i32 = arith.constant 0 : i32
    %c0_i32_0 = arith.constant 0 : i32
    %c0_i32_1 = arith.constant 0 : i32
    return %arg1, %c0_i32, %c0_i32_0 : i32, i32, i32
  }
  func.func @transform_20(%arg0: i32, %arg1: i32) -> (i32, i32, i32) {
    %c0_i32 = arith.constant 0 : i32
    %c0_i32_0 = arith.constant 0 : i32
    %c0_i32_1 = arith.constant 0 : i32
    return %arg1, %c0_i32, %c0_i32_0 : i32, i32, i32
  }
  func.func @transform_21(%arg0: i32, %arg1: i32) -> (i32, i32, i32) {
    %c0_i32 = arith.constant 0 : i32
    %c0_i32_0 = arith.constant 0 : i32
    %c0_i32_1 = arith.constant 0 : i32
    return %arg1, %c0_i32, %c0_i32_0 : i32, i32, i32
  }
  func.func @transform_22(%arg0: i32, %arg1: i32) -> (i32, i32) {
    %c0_i32 = arith.constant 0 : i32
    %c0_i32_0 = arith.constant 0 : i32
    %c0_i32_1 = arith.constant 0 : i32
    return %c0_i32, %c0_i32_0 : i32, i32
  }
  func.func @transform_23(%arg0: i32, %arg1: i32) -> (i32, i32) {
    %c0_i32 = arith.constant 0 : i32
    %c0_i32_0 = arith.constant 0 : i32
    %c0_i32_1 = arith.constant 0 : i32
    return %c0_i32, %c0_i32_0 : i32, i32
  }
  func.func @transform_24(%arg0: i32, %arg1: i32) -> (i32, i32, i32) {
    %c0_i32 = arith.constant 0 : i32
    %c0_i32_0 = arith.constant 0 : i32
    %c0_i32_1 = arith.constant 0 : i32
    return %arg0, %c0_i32, %c0_i32_0 : i32, i32, i32
  }
}

</mosaic_0001>

<bundles_post_ra>
// kernel: vit_feature_extractor.1
= control target key start
LH: loop header
LB: loop body
LE: loop exit
PB: predicated region body
PF: predicated region fallthrough
CT: control target
= control target key end

     0   :  { %s3113_s26 = smov 0   ;;  %s3115_s27 = smov 0   ;;  %s3567_s0 = inlined_call_operand.vmem [shape: bf16[2,4,768], index: 0, kind: input, shape index: {}]   ;;  %s3568_s1 = inlined_call_operand.vmem [shape: bf16[768,32], index: 1, kind: input, shape index: {}]   ;;  %s3569_s2 = inlined_call_operand.vmem [shape: f32[1,32], index: 2, kind: input, shape index: {}]   ;;  %s3570_s3 = inlined_call_operand.vmem [shape: f32[1,32], index: 3, kind: input, shape index: {}]   ;;  %s3571_s4 = inlined_call_operand.vmem [shape: f32[1,32], index: 4, kind: input, shape index: {}]   ;;  %s3572_s5 = inlined_call_operand.vmem [shape: f32[6,32], index: 5, kind: input, shape index: {}]   ;;  %s3573_s6 = inlined_call_operand.vmem [shape: f32[2,1,32], index: 6, kind: input, shape index: {}]   ;;  %s3574_s7 = inlined_call_operand.vmem [shape: f32[2,1,32], index: 7, kind: input, shape index: {}]   ;;  %s3575_s8 = inlined_call_operand.vmem [shape: bf16[2,32,32], index: 8, kind: input, shape index: {}]   ;;  %s3576_s9 = inlined_call_operand.vmem [shape: f32[2,1,32], index: 9, kind: input, shape index: {}]   ;;  %s3577_s10 = inlined_call_operand.vmem [shape: bf16[2,32,32], index: 10, kind: input, shape index: {}]   ;;  %s3578_s11 = inlined_call_operand.vmem [shape: f32[2,1,32], index: 11, kind: input, shape index: {}]   ;;  %s3579_s12 = inlined_call_operand.vmem [shape: bf16[2,32,32], index: 12, kind: input, shape index: {}]   ;;  %s3580_s13 = inlined_call_operand.vmem [shape: f32[2,1,32], index: 13, kind: input, shape index: {}]   ;;  %s3581_s14 = inlined_call_operand.vmem [shape: bf16[2,32,32], index: 14, kind: input, shape index: {}]   ;;  %s3582_s15 = inlined_call_operand.vmem [shape: f32[2,1,32], index: 15, kind: input, shape index: {}]   ;;  %s3583_s16 = inlined_call_operand.vmem [shape: f32[2,1,32], index: 16, kind: input, shape index: {}]   ;;  %s3584_s17 = inlined_call_operand.vmem [shape: f32[2,1,32], index: 17, kind: input, shape index: {}]   ;;  %s3585_s18 = inlined_call_operand.vmem [shape: bf16[2,32,128], index: 18, kind: input, shape index: {}]   ;;  %s3586_s19 = inlined_call_operand.vmem [shape: f32[2,1,128], index: 19, kind: input, shape index: {}]   ;;  %s3587_s20 = inlined_call_operand.vmem [shape: bf16[2,128,32], index: 20, kind: input, shape index: {}]   ;;  %s3588_s21 = inlined_call_operand.vmem [shape: f32[2,1,32], index: 21, kind: input, shape index: {}]   ;;  %s3589_s22 = inlined_call_operand.vmem [shape: f32[1,32], index: 22, kind: input, shape index: {}]   ;;  %s3590_s23 = inlined_call_operand.vmem [shape: f32[1,32], index: 23, kind: input, shape index: {}]   ;;  %s3591_s24 = inlined_call_operand.vmem [shape: f32[2,2,32], index: 24, kind: output, shape index: {}]  }
   0x1   :  { %3597 = sst [smem:[#allocation9_spill]] %s3567_s0  ;;  %s3117_s28 = smov 0  }
   0x2   :  { %3598 = sst [smem:[#allocation10_spill]] %s3568_s1 }
   0x3   :  { %3599 = sst [smem:[#allocation11_spill]] %s3569_s2 }
   0x4   :  { %3600 = sst [smem:[#allocation12_spill]] %s3570_s3 }
   0x5   :  { %3601 = sst [smem:[#allocation13_spill]] %s3571_s4 }
   0x6   :  { %3602 = sst [smem:[#allocation14_spill]] %s3572_s5  ;;  %s3111_s5 = smov 0  }
   0x7   :  { %3603 = sst [smem:[#allocation15_spill]] %s3573_s6  ;;  %s3119_s6 = smov 0  }
   0x8   :  { %3604 = sst [smem:[#allocation16_spill]] %s3574_s7 }
   0x9   :  { %3605 = sst [smem:[#allocation17_spill]] %s3575_s8 }
   0xa   :  { %3606 = sst [smem:[#allocation18_spill]] %s3576_s9 }
   0xb   :  { %3607 = sst [smem:[#allocation19_spill]] %s3577_s10 }
   0xc   :  { %3608 = sst [smem:[#allocation20_spill]] %s3579_s12 }
   0xd   :  { %3609 = sst [smem:[#allocation21_spill]] %s3581_s14 }
   0xe   :  { %3610 = sst [smem:[#allocation22_spill]] %s3582_s15 }
   0xf   :  { %3611 = sst [smem:[#allocation23_spill]] %s3583_s16 }
  0x10   :  { %3612 = sst [smem:[#allocation24_spill]] %s3587_s20 }
  0x11   :  { %3613 = sst [smem:[#allocation25_spill]] %s3588_s21 }
  0x12   :  { %3614 = sst [smem:[#allocation26_spill]] %s3589_s22 }
  0x13   :  { %3615 = sst [smem:[#allocation27_spill]] %s3590_s23 }
  0x14   :  { %3616 = sst [smem:[#allocation28_spill]] %s3591_s24 }
  0x15 LB: > { %3617 = sst [smem:[#allocation3_spill]] %s2964_s5  ;;  %s43_s2 = sadd.s32 1, %s2972_s27  ;;  %s2980_s6 = sphi %s3119_s6, %s34_s6   ;;  %s2976_s28 = sphi %s3117_s28, %s3664_s28   ;;  %s2972_s27 = sphi %s3115_s27, %s3663_s27   ;;  %s2968_s26 = sphi %s3113_s26, %s3662_s26   ;;  %s2964_s5 = sphi %s3111_s5, %s3661_s5  }
  0x16   : > { %3618 = sst [smem:[#allocation4_spill]] %s2972_s27  ;;  %s46_s29 = sadd.s32 1, %s2976_s28 }
  0x17   : > { %3619 = sst [smem:[#allocation5_spill]] %s2976_s28  ;;  %p44_p0 = scmp.ge.s32.totalorder %s43_s2, 2 }
  0x18   : > { %3620 = sst [smem:[#allocation6_spill]] %s2980_s6  ;;  %p2494_p1 = scmp.ge.s32.totalorder %s2980_s6, 1 }
  0x19   : > { %p814_p2 = scmp.lt.s32.totalorder %s2980_s6, 5  ;;  %s3666_s2 = smov (%p44_p0, %s43_s2), 0 }
  0x1a   : > { %3621 = sst [smem:[#allocation7_spill]] %s3666_s2  ;;  %s3668_s29 = smov (!%p44_p0, %s46_s29), %s2976_s28 }
  0x1b   : > { %p815_p3 = pnand %p2494_p1, %p814_p2  ;;  %p48_p4 = scmp.ge.s32.totalorder %s3668_s29, 2 }
  0x1c   : > { %p939_p5 = scmp.lt.s32.totalorder (!%p815_p3), %s2968_s26, 1  ;;  %p944_p6 = scmp.lt.s32.totalorder (!%p815_p3), %s2964_s5, 1 }
  0x1d   : > { %s3670_s29 = smov (%p48_p4, %s3668_s29), 0  ;;  %818 = sbr.rel (%p815_p3) target bundleno = 2759 (0xac7), region = 116 }
  0x1e   : > { %3622 = sst [smem:[#allocation8_spill]] %s3670_s29 }
  0x1f   : > { %s3625_s23 = sld [smem:[#allocation9_spill]] (!%p815_p3) }
  0x20   : > { %s3628_s10 = sld [smem:[#allocation19_spill]] (!%p815_p3) }
  0x21   : > { %s3629_s12 = sld [smem:[#allocation20_spill]] (!%p815_p3) }
  0x22   : > { %s3672_s26 = smov (!%p939_p5, %s2968_s26), 1  ;;  %s3630_s14 = sld [smem:[#allocation21_spill]] }
  0x23   : > { %s3145_s0 = scalar_select %p944_p6, %s2964_s5, 1 }
  0x24   : > { %s2855_s7 = smul.u32 12, %s3672_s26  ;;  %s2508_s30 = sshll.u32 %s3672_s26, 1 }
  0x25   : > { %s2785_s5 = sshll.u32 %s3145_s0, 4  ;;  %s3626_s26 = sld [smem:[#allocation17_spill]] }
  0x26   : > { %s3158_s22 = scalar_lea.vmem %s3625_s23, %s2855_s7  ;;  %s3173_s2 = scalar_lea.vmem %s3628_s10, %s2785_s5 }
  0x27   : > { %s3182_s28 = scalar_lea.vmem %s3629_s12, %s2785_s5  ;;  %s3208_s24 = scalar_lea.vmem %s3585_s18, %s2785_s5 }
  0x28   : > { %s3191_s8 = scalar_lea.vmem %s3630_s14, %s2785_s5  ;;  %s2790_s14 = sshll.u32 %s3145_s0, 6 }
  0x29   : > { %s3633_s10 = sld [smem:[#allocation25_spill]] }
  0x2a   : > { %s3634_s23 = sld [smem:[#allocation24_spill]] }
  0x2b   : > { %s3164_s21 = scalar_lea.vmem %s3626_s26, %s2785_s5  ;;  %s3635_s12 = sld [smem:[#allocation28_spill]] }
  0x2c   : > { %s3636_s5 = sld [smem:[#allocation3_spill]] }
  0x2f   : > { %s1003_s15 = scalar_lea.vmem %s3633_s10, %s3145_s0 }
  0x30   : > { %s3222_s16 = scalar_lea.vmem %s3634_s23, %s2790_s14 }
  0x31   : > { %s3227_s9 = scalar_lea.vmem %s3635_s12, %s2508_s30 }
  0x32   : > { %p2509_p7 = scmp.ne.s32.totalorder %s3636_s5, 0 }
  0x33   : > { %s3637_s25 = sld [smem:[#allocation10_spill]] (!%p2509_p7) }
  0x34   : > { %1012 = sbr.rel (%p2509_p7) target bundleno = 257 (0x101), region = 120  ;;  %s3638_s14 = sld [smem:[#allocation11_spill]] (!%p2509_p7) }
  0x35   : > { %s3639_s30 = sld [smem:[#allocation13_spill]] (!%p2509_p7) }
  0x36   : > { %s3641_s6 = sld [smem:[#allocation14_spill]] (!%p2509_p7) }
  0x39   : > { %v2798_v0 = vld [vmem:[%s3637_s25 + $0x38] sm:$0xff]  ;;  %v2797_v2 = vld [vmem:[%s3637_s25 + $0x30] sm:$0xff]  ;;  %v2796_v8 = vld [vmem:[%s3637_s25 + $0x28] sm:$0xff]  ;;  %vm1506_vm0 = vcmask 1040384   ;;  %vm1508_vm1 = vcmask 1041408   ;;  %vm1512_vm2 = vcmask 259072  }
  0x3a   : > { %v2806_v1 = vld [vmem:[%s3637_s25 + $0x78] sm:$0xff]  ;;  %1420 = vmatpush.bf16.msra.mxu0 %v2798_v0  ;;  %v2805_v3 = vld [vmem:[%s3637_s25 + $0x70] sm:$0xff]  ;;  %v2804_v9 = vld [vmem:[%s3637_s25 + $0x68] sm:$0xff] }
  0x3b   : > { %1433 = vmatpush.bf16.msra.mxu1 %v2806_v1  ;;  %v2814_v4 = vld [vmem:[%s3637_s25 + $0xb8] sm:$0xff]  ;;  %v2813_v6 = vld [vmem:[%s3637_s25 + $0xb0] sm:$0xff]  ;;  %v2812_v10 = vld [vmem:[%s3637_s25 + $0xa8] sm:$0xff] }
  0x3c   : > { %v2822_v5 = vld [vmem:[%s3637_s25 + $0xf8] sm:$0xff]  ;;  %1446 = vmatpush.bf16.msra.mxu2 %v2814_v4  ;;  %v2821_v7 = vld [vmem:[%s3637_s25 + $0xf0] sm:$0xff]  ;;  %v2820_v11 = vld [vmem:[%s3637_s25 + $0xe8] sm:$0xff] }
  0x3d   : > { %1459 = vmatpush.bf16.msra.mxu3 %v2822_v5  ;;  %v2795_v12 = vld [vmem:[%s3637_s25 + $0x20] sm:$0xff]  ;;  %v2794_v16 = vld [vmem:[%s3637_s25 + $0x18] sm:$0xff]  ;;  %v2793_v21 = vld [vmem:[%s3637_s25 + $0x10] sm:$0xff] }
  0x3e   : > { %1421 = vmatpush.bf16.msra.mxu0 %v2797_v2  ;;  %v2803_v13 = vld [vmem:[%s3637_s25 + $0x60] sm:$0xff]  ;;  %v2802_v18 = vld [vmem:[%s3637_s25 + $0x58] sm:$0xff]  ;;  %v2801_v22 = vld [vmem:[%s3637_s25 + $0x50] sm:$0xff] }
  0x3f   : > { %1434 = vmatpush.bf16.msra.mxu1 %v2805_v3  ;;  %v1013_v14 = vld [vmem:[%s3158_s22] sm:$0xff]  ;;  %v2810_v19 = vld [vmem:[%s3637_s25 + $0x98] sm:$0xff]  ;;  %v2809_v23 = vld [vmem:[%s3637_s25 + $0x90] sm:$0xff] }
  0x40   : > { %1447 = vmatpush.bf16.msra.mxu2 %v2813_v6  ;;  %v2811_v15 = vld [vmem:[%s3637_s25 + $0xa0] sm:$0xff]  ;;  %1116 = vst [vmem:[#allocation1] ss:$4 sm:$0xff] %v1013_v14  ;;  %v2818_v20 = vld [vmem:[%s3637_s25 + $0xd8] sm:$0xff]  ;;  %v2817_v24 = vld [vmem:[%s3637_s25 + $0xd0] sm:$0xff] }
  0x41   : > { %1460 = vmatpush.bf16.msra.mxu3 %v2821_v7  ;;  %v2819_v17 = vld [vmem:[%s3637_s25 + $0xe0] sm:$0xff]  ;;  %v1014_v25 = vld [vmem:[%s3158_s22 + $0x8] sm:$0xf]  ;;  %v2830_v32 = vld [vmem:[%s3637_s25 + $0x138] sm:$0xff]  ;;  %s3640_s22 = sld [smem:[#allocation12_spill]] }
  0x42   : > { %1422 = vmatpush.bf16.msra.mxu0 %v2796_v8  ;;  %v2792_v26 = vld [vmem:[%s3637_s25 + $0x8] sm:$0xff]  ;;  %1119 = vst [vmem:[#allocation1 + $0x20] ss:$4 sm:$0xff] %v1014_v25  ;;  %v2791_v30 = vld [vmem:[%s3637_s25] sm:$0xff]  ;;  %v2838_v33 = vld [vmem:[%s3637_s25 + $0x178] sm:$0xff] }
  0x43   : > { %1435 = vmatpush.bf16.msra.mxu1 %v2804_v9  ;;  %v2800_v27 = vld [vmem:[%s3637_s25 + $0x48] sm:$0xff]  ;;  %v2799_v31 = vld [vmem:[%s3637_s25 + $0x40] sm:$0xff]  ;;  %v2829_v38 = vld [vmem:[%s3637_s25 + $0x130] sm:$0xff] }
  0x44   : > { %1448 = vmatpush.bf16.msra.mxu2 %v2812_v10  ;;  %v2808_v28 = vld [vmem:[%s3637_s25 + $0x88] sm:$0xff]  ;;  %v2807_v34 = vld [vmem:[%s3637_s25 + $0x80] sm:$0xff]  ;;  %v2837_v39 = vld [vmem:[%s3637_s25 + $0x170] sm:$0xff] }
  0x45   : > { %1461 = vmatpush.bf16.msra.mxu3 %v2820_v11  ;;  %v2816_v29 = vld [vmem:[%s3637_s25 + $0xc8] sm:$0xff]  ;;  %v2815_v35 = vld [vmem:[%s3637_s25 + $0xc0] sm:$0xff]  ;;  %v2826_v46 = vld [vmem:[%s3637_s25 + $0x118] sm:$0xff] }
  0x46   : > { %1423 = vmatpush.bf16.msra.mxu0 %v2795_v12  ;;  %v2828_v42 = vld [vmem:[%s3637_s25 + $0x128] sm:$0xff]  ;;  %v2827_v44 = vld [vmem:[%s3637_s25 + $0x120] sm:$0xff]  ;;  %v2834_v47 = vld [vmem:[%s3637_s25 + $0x158] sm:$0xff] }
  0x47   : > { %1436 = vmatpush.bf16.msra.mxu1 %v2803_v13  ;;  %v1120_v36 = vld.sshfl [vmem:[#allocation1] sm:$0xff pattern:$0x73625140]  ;;  %v1121_v37 = vld.sshfl [vmem:[#allocation1 + $0x8] sm:$0xff pattern:$0x73625140] }
  0x48   : > { %1449 = vmatpush.bf16.msra.mxu2 %v2811_v15  ;;  %v1122_v40 = vld.sshfl [vmem:[#allocation1 + $0x10] sm:$0xff pattern:$0x73625140]  ;;  %v1123_v41 = vld.sshfl [vmem:[#allocation1 + $0x18] sm:$0xff pattern:$0x73625140] }
  0x49   : > { %1462 = vmatpush.bf16.msra.mxu3 %v2819_v17  ;;  %v2836_v43 = vld [vmem:[%s3637_s25 + $0x168] sm:$0xff]  ;;  %v2835_v45 = vld [vmem:[%s3637_s25 + $0x160] sm:$0xff]  ;;  %v2825_v48 = vld [vmem:[%s3637_s25 + $0x110] sm:$0xff] }
  0x4a   : > { %1424 = vmatpush.bf16.msra.mxu0 %v2794_v16  ;;  %v2833_v49 = vld [vmem:[%s3637_s25 + $0x150] sm:$0xff]  ;;  %v2824_v50 = vld [vmem:[%s3637_s25 + $0x108] sm:$0xff]  ;;  %v2823_v52 = vld [vmem:[%s3637_s25 + $0x100] sm:$0xff] }
  0x4b   : > { %1437 = vmatpush.bf16.msra.mxu1 %v2802_v18  ;;  %v2832_v51 = vld [vmem:[%s3637_s25 + $0x148] sm:$0xff]  ;;  %v2831_v53 = vld [vmem:[%s3637_s25 + $0x140] sm:$0xff] }
  0x4c   : > { %1450 = vmatpush.bf16.msra.mxu2 %v2810_v19  ;;  %v1124_v54 = vld.sshfl [vmem:[#allocation1 + $0x20] sm:$0xff pattern:$0x73625140]  ;;  %v1125_v55 = vld.sshfl [vmem:[#allocation1 + $0x28] sm:$0xff pattern:$0x73625140] }
  0x4d   : > { %1463 = vmatpush.bf16.msra.mxu3 %v2818_v20  ;;  %v2900_v62 = vld [vmem:[%s3638_s14] ss:$0 sm:$0xff] }
  0x4e   : > { %1425 = vmatpush.bf16.msra.mxu0 %v2793_v21  ;;  %v2901_v7 = vld [vmem:[%s3639_s30] ss:$0 sm:$0xff] }
  0x4f   : > { %1438 = vmatpush.bf16.msra.mxu1 %v2801_v22  ;;  %v1498_v9 = vld [vmem:[%s3640_s22] sm:$0x1] }
  0x50   : > { %1451 = vmatpush.bf16.msra.mxu2 %v2809_v23  ;;  %v1507_v11 = vsel %vm1506_vm0, %v1498_v9, %v2901_v7  ;;  %v1510_v13 = vld [vmem:[%s3641_s6] sm:$0x3f] }
  0x51   : > { %1464 = vmatpush.bf16.msra.mxu3 %v2817_v24 }
  0x52   : > { %1426 = vmatpush.bf16.msra.mxu0 %v2792_v26 }
  0x53   : > { %1439 = vmatpush.bf16.msra.mxu1 %v2800_v27 }
  0x54   : > { %1452 = vmatpush.bf16.msra.mxu2 %v2808_v28 }
  0x55   : > { %1465 = vmatpush.bf16.msra.mxu3 %v2816_v29 }
  0x56   : > { %1427 = vmatpush.bf16.msra.mxu0 %v2791_v30 }
  0x57   : > { %1440 = vmatpush.bf16.msra.mxu1 %v2799_v31 }
  0x58   : > { %1453 = vmatpush.bf16.msra.mxu2 %v2807_v34 }
  0x59   : > { %1428 = vmatmul.bf16.vlgmr.msra.gmra.mxu0 %v1120_v36  ;;  %1466 = vmatpush.bf16.msra.mxu3 %v2815_v35 }
  0x5a   : > { %1472 = vmatpush.bf16.msrb.mxu0 %v2830_v32  ;;  %1441 = vmatmul.bf16.vlgmr.msra.gmra.mxu1 %v1121_v37 }
  0x5b   : > { %1485 = vmatpush.bf16.msrb.mxu1 %v2838_v33  ;;  %1454 = vmatmul.bf16.vlgmr.msra.gmra.mxu2 %v1122_v40 }
  0x5c   : > { %1467 = vmatmul.bf16.vlgmr.msra.gmra.mxu3 %v1123_v41 }
  0x5e   : > { %1473 = vmatpush.bf16.msrb.mxu0 %v2829_v38 }
  0x5f   : > { %1486 = vmatpush.bf16.msrb.mxu1 %v2837_v39 }
  0x62   : > { %1474 = vmatpush.bf16.msrb.mxu0 %v2828_v42 }
  0x63   : > { %1487 = vmatpush.bf16.msrb.mxu1 %v2836_v43 }
  0x66   : > { %1475 = vmatpush.bf16.msrb.mxu0 %v2827_v44 }
  0x67   : > { %1488 = vmatpush.bf16.msrb.mxu1 %v2835_v45 }
  0x6a   : > { %1476 = vmatpush.bf16.msrb.mxu0 %v2826_v46 }
  0x6b   : > { %1489 = vmatpush.bf16.msrb.mxu1 %v2834_v47 }
  0x6e   : > { %1477 = vmatpush.bf16.msrb.mxu0 %v2825_v48 }
  0x6f   : > { %1490 = vmatpush.bf16.msrb.mxu1 %v2833_v49 }
  0x72   : > { %1478 = vmatpush.bf16.msrb.mxu0 %v2824_v50 }
  0x73   : > { %1491 = vmatpush.bf16.msrb.mxu1 %v2832_v51 }
  0x76   : > { %1479 = vmatpush.bf16.msrb.mxu0 %v2823_v52 }
  0x77   : > { %1492 = vmatpush.bf16.msrb.mxu1 %v2831_v53 }
  0x79   : > { %1480 = vmatmul.bf16.vlgmr.msrb.gmra.mxu0 %v1124_v54 }
  0x7a   : > { %1493 = vmatmul.bf16.vlgmr.msrb.gmra.mxu1 %v1125_v55 }
  0xd6   : > { %v1429_v56 = vpop.f32.mrf.mxu0 }
  0xd7   : > { %v1442_v57 = vpop.f32.mrf.mxu1  ;;  %v1430_v63 = vadd.f32 %v2900_v62, %v1429_v56 }
  0xd9   : > { %v1443_v2 = vadd.f32 %v1442_v57, %v1430_v63 }
  0xde   : > { %v1431_v58 = vpop.f32.mrf.mxu0  ;;  %v1455_v60 = vpop.f32.mrf.mxu2 }
  0xdf   : > { %v1444_v59 = vpop.f32.mrf.mxu1  ;;  %v1468_v61 = vpop.f32.mrf.mxu3  ;;  %v1456_v3 = vadd.f32 %v1455_v60, %v1443_v2 }
  0xe1   : > { %v1469_v4 = vadd.f32 %v1468_v61, %v1456_v3 }
  0xe6   : > { %v1457_v0 = vpop.f32.mrf.mxu2 }
  0xe7   : > { %v1470_v1 = vpop.f32.mrf.mxu3 }
  0xf6   : > { %v1481_v5 = vpop.f32.mrf.mxu0 }
  0xf7   : > { %v1494_v6 = vpop.f32.mrf.mxu1  ;;  %v1482_v8 = vadd.f32 %v1481_v5, %v1469_v4 }
  0xf9   : > { %v1495_v10 = vadd.f32 %v1494_v6, %v1482_v8 }
  0xfb   : > { %v1504_v12 = vrot.slane %v1495_v10, 6 }
  0xfd   : > { %v1509_v14 = vsel %vm1508_vm1, %v1507_v11, %v1504_v12 }
  0xfe   : > { %v1511_v15 = vadd.f32 %v1510_v13, %v1509_v14  ;;  %v1483_v16 = vpop.f32.mrf.mxu0 }
  0xff   : > { %v1496_v17 = vpop.f32.mrf.mxu1 }
 0x100   : > { %1513 = vst.msk [vmem:[#allocation2] sm:$0x3f] %vm1512_vm2, %v1511_v15 }
 0x101 PF: > { %vm1517_vm3 = vcmask 259072   ;;  %v2982_v20 = vmov 32.0   ;;  %v2840_v32 = vld [vmem:[%s3164_s21 + $0x8] sm:$0xff]  ;;  %v2839_v34 = vld [vmem:[%s3164_s21] sm:$0xff]  ;;  %s3642_s7 = sld [smem:[#allocation15_spill]]  ;;  %vm1576_vm8 = vcmask 261120   ;;  %s3646_s23 = scalar_lea.vmem %s3580_s13, %s3145_s0 }
 0x102   : > { %2912 = vrcp.f32 %v2982_v20  ;;  %v2844_v33 = vld [vmem:[%s3182_s28 + $0x8] sm:$0xff]  ;;  %1586 = vmatpush.bf16.msra.mxu1 %v2840_v32  ;;  %v2843_v35 = vld [vmem:[%s3182_s28] sm:$0xff]  ;;  %s3644_s3 = sld [smem:[#allocation16_spill]]  ;;  %vm1717_vm9 = vcmask 1042432   ;;  %s3647_s29 = scalar_lea.vmem %s3578_s11, %s3145_s0  ;;  %vm1667_vm10 = vcmask 64512   ;;  %vm1687_vm11 = vcmask 46080  }
 0x103   : > { %1653 = vmatpush.bf16.msra.mxu2 %v2844_v33  ;;  %v2842_v36 = vld [vmem:[%s3173_s2 + $0x8] sm:$0xff]  ;;  %v2841_v39 = vld [vmem:[%s3173_s2] sm:$0xff]  ;;  %s3648_s27 = sld [smem:[#allocation18_spill]]  ;;  %s2983_s6 = smov 112   ;;  %vm1811_vm12 = vcmask 1043456   ;;  %vm1713_vm1 = vcmask 48128  }
 0x104   : > { %v2905_v55 = vld [vmem:[%s3646_s23] ss:$0 sm:$0xff]  ;;  %s2984_s21 = smov 120   ;;  %s2985_s28 = smov 104  }
 0x105   : > { %v2906_v61 = vld [vmem:[%s3647_s29] ss:$0 sm:$0xff]  ;;  %s3654_s23 = scalar_lea.vmem %s3584_s17, %s3145_s0  ;;  %s3655_s29 = scalar_lea.vmem %s3586_s19, %s3145_s0 }
 0x106   : > { %1587 = vmatpush.bf16.msra.mxu1 %v2839_v34  ;;  %v1660_v33 = vld [vmem:[%s3191_s8] sm:$0xf] }
 0x107   : > { %v3388_v18 = vld [vmem:[#allocation2] sm:$0x3f]  ;;  %1654 = vmatpush.bf16.msra.mxu2 %v2843_v35  ;;  %s3643_s5 = scalar_lea.vmem %s3642_s7, %s3145_s0  ;;  %v1832_v34 = vsel %vm1811_vm12, %v1660_v33, 0 }
 0x108   : > { %v1518_v19 = vsel %vm1517_vm3, %v3388_v18, 0.0  ;;  %v2913_v21 = vpop.eup %2912  ;;  %v2902_v47 = vld [vmem:[%s3643_s5] ss:$0 sm:$0xff]  ;;  %s3645_s4 = scalar_lea.vmem %s3644_s3, %s3145_s0  ;;  %s3650_s5 = sld [smem:[#allocation22_spill]] }
 0x109   : > { %1519 = vadd.xlane.f32.xlu0 %v1518_v19  ;;  %v1522_v22 = vmul.f32 32.0, %v2913_v21  ;;  %vm1526_vm4 = vweird.f32 %v2913_v21  ;;  %v2903_v50 = vld [vmem:[%s3645_s4] ss:$0 sm:$0xff]  ;;  %s3649_s26 = scalar_lea.vmem %s3648_s27, %s3145_s0  ;;  %s3652_s3 = sld [smem:[#allocation23_spill]] }
 0x10a   : > { %1620 = vmatpush.bf16.msrb.mxu1 %v2842_v36  ;;  %v2904_v63 = vld [vmem:[%s3649_s26] ss:$0 sm:$0xff]  ;;  %s3657_s27 = sld [smem:[#allocation3_spill]] }
 0x10b   : > { %v1523_v23 = vsub.f32 1.0, %v1522_v22 }
 0x10d   : > { %v1524_v24 = vmul.f32 %v2913_v21, %v1523_v23 }
 0x10e   : > { %1621 = vmatpush.bf16.msrb.mxu1 %v2841_v39  ;;  %s3651_s2 = scalar_lea.vmem %s3650_s5, %s3145_s0 }
 0x10f   : > { %v1525_v25 = vadd.f32 %v2913_v21, %v1524_v24  ;;  %s3653_s4 = scalar_lea.vmem %s3652_s3, %s3145_s0 }
 0x110   : > { %p2782_p8 = scmp.ne.s32.totalorder %s3657_s27, 1 }
 0x111   : > { %v3392_v26 = vsel %vm1526_vm4, %v2913_v21, %v1525_v25  ;;  %s3658_s26 = sld [smem:[#allocation26_spill]] (!%p2782_p8) }
 0x17c   : > { %v1520_v27 = vpop.xlane.xlu0 %1519 }
 0x17d   : > { %v1528_v28 = vmul.f32 %v3392_v26, %v1520_v27 }
 0x17f   : > { %v1529_v29 = vsub.f32 %v3388_v18, %v1528_v28 }
 0x181   : > { %v1530_v30 = vmul.f32 %v1529_v29, %v1529_v29 }
 0x183   : > { %v1531_v31 = vsel %vm1517_vm3, %v1530_v30, 0.0 }
 0x184   : > { %1532 = vadd.xlane.f32.xlu0 %v1531_v31 }
 0x1f7   : > { %v1533_v37 = vpop.xlane.xlu0 %1532 }
 0x1f8   : > { %v1534_v38 = vmul.f32 %v1533_v37, %v3392_v26 }
 0x1fa   : > { %v1535_v40 = vadd.f32 1e-06, %v1534_v38 }
 0x1fc   : > { %2914 = vrsqrt.f32 %v1535_v40  ;;  %vm1542_vm6 = vweird.f32 %v1535_v40 }
 0x202   : > { %v2915_v41 = vpop.eup %2914 }
 0x203   : > { %v1537_v42 = vmul.f32 %v2915_v41, %v1535_v40  ;;  %vm1543_vm5 = vweird.f32 %v2915_v41 }
 0x204   : > { %vm1544_vm7 = vmor %vm1542_vm6, %vm1543_vm5 }
 0x205   : > { %v1538_v43 = vmul.f32 %v2915_v41, %v1537_v42 }
 0x207   : > { %v1539_v44 = vmul.f32 0.5, %v1538_v43 }
 0x209   : > { %v1540_v45 = vsub.f32 1.5, %v1539_v44 }
 0x20b   : > { %v1541_v46 = vmul.f32 %v2915_v41, %v1540_v45 }
 0x20d   : > { %v1545_v48 = vsel %vm1544_vm7, %v2915_v41, %v1541_v46 }
 0x20e   : > { %v1546_v49 = vmul.f32 %v1545_v48, %v1529_v29 }
 0x210   : > { %v1550_v51 = vmul.f32 %v2902_v47, %v1546_v49 }
 0x212   : > { %v1554_v52 = vadd.f32 %v2903_v50, %v1550_v51 }
 0x214   : > { %v1555_v53 = vpack.c.bf16 %v1554_v52, %v1554_v52 }
 0x216   : > { %2710 = vmatmul.msk.bf16.vlgmr.msra.gmra.mxu1 %vm1576_vm8, %v1555_v53  ;;  %2728 = vmatmul.msk.bf16.vlgmr.msra.gmra.mxu2 %vm1576_vm8, %v1555_v53 }
 0x226   : > { %2719 = vmatmul.msk.bf16.vlgmr.msrb.gmra.mxu1 %vm1576_vm8, %v1555_v53 }
 0x293   : > { %v1589_v54 = vpop.f32.mrf.mxu1 }
 0x294   : > { %v1590_v2 = vadd.f32 %v2904_v63, %v1589_v54 }
 0x296   : > { %v1593_v5 = vmul.f32 0.35355338, %v1590_v2 }
 0x298   : > { %v1664_v7 = vpack.c.bf16 %v1593_v5, %v1593_v5 }
 0x299   : > { %v1656_v56 = vpop.f32.mrf.mxu2 }
 0x29a   : > { %v1657_v57 = vadd.f32 %v2905_v55, %v1656_v56 }
 0x29b   : > { %v1591_v58 = vpop.f32.mrf.mxu1 }
 0x29c   : > { %v3422_v59 = vpack.c.bf16 %v1657_v57, %v1657_v57 }
 0x29e   : > { %v1719_v60 = vsel %vm1717_vm9, %v3422_v59, 0 }
 0x29f   : > { %1728 = vmatpush.bf16.msra.mxu0 %v1719_v60 }
 0x2a1   : > { %v1658_v62 = vpop.f32.mrf.mxu2 }
 0x2a3   : > { %v1623_v0 = vpop.f32.mrf.mxu1  ;;  %1841 = vmatpush.bf16.msrb.mxu0 %v1832_v34 }
 0x2a4   : > { %v1624_v1 = vadd.f32 %v2906_v61, %v1623_v0 }
 0x2a6   : > { %v1665_v3 = vpack.c.bf16 %v1624_v1, %v1624_v1 }
 0x2a8   : > { %1849 = vrot.lane.b32.xlu0 %v1665_v3, %s2983_s6  ;;  %1739 = vrot.lane.b32.xlu2 %v1665_v3, %s2984_s21  ;;  %v1672_v4 = vsel %vm1667_vm10, %v1665_v3, 0 }
 0x2a9   : > { %1681 = vmatpush.bf16.xpose.msra.mxu3 %v1672_v4 }
 0x2ab   : > { %v1625_v6 = vpop.f32.mrf.mxu1 }
 0x2b0   : > { %1736 = vrot.lane.b32.xlu2 %v1664_v7, %s2984_s21  ;;  %2729 = vmatmul.msk.bf16.vlgmr.msra.gmra.mxu3 %vm1667_vm10, %v1664_v7 }
 0x2b8   : > { %1939 = vrot.lane.b32.xlu2 %v1665_v3, %s2985_s28 }
 0x2c0   : > { %1937 = vrot.lane.b32.xlu2 %v1664_v7, %s2985_s28 }
 0x302   : > { %v1740_v8 = vpop.permute.xlu2 %1739 }
 0x303   : > { %v1745_v9 = vsel %vm1667_vm10, %v1740_v8, 0  ;;  %v1661_v8 = vld [vmem:[%s3191_s8 + $0x4] sm:$0xf] }
 0x304   : > { %1754 = vmatpush.bf16.xpose.msra.mxu1 %v1745_v9  ;;  %v1813_v9 = vsel %vm1811_vm12, %v1661_v8, 0 }
 0x305   : > { %1822 = vmatpush.bf16.msrb.mxu3 %v1813_v9 }
 0x30a   : > { %v1737_v10 = vpop.permute.xlu2 %1736 }
 0x30b   : > { %2731 = vmatmul.msk.bf16.vlgmr.msra.gmra.mxu1 %vm1667_vm10, %v1737_v10 }
 0x312   : > { %v1940_v25 = vpop.permute.xlu2 %1939 }
 0x313   : > { %v1945_v48 = vsel %vm1667_vm10, %v1940_v25, 0 }
 0x31a   : > { %v1850_v11 = vpop.permute.xlu0 %1849  ;;  %v3450_v27 = vpop.permute.xlu2 %1937 }
 0x31b   : > { %v1855_v12 = vsel %vm1667_vm10, %v1850_v11, 0 }
 0x31c   : > { %1864 = vmatpush.bf16.xpose.msrb.mxu1 %v1855_v12 }
 0x333   : > { %v1683_v13 = vpop.f32.mrf.mxu3 }
 0x334   : > { %v1688_v14 = vsel %vm1687_vm11, %v1683_v13, -inf }
 0x335   : > { %1689 = vmax.xlane.f32.xlu1 %v1688_v14 }
 0x33b   : > { %v1685_v15 = vpop.f32.mrf.mxu3 }
 0x388   : > { %v1756_v16 = vpop.f32.mrf.mxu1 }
 0x389   : > { %v1760_v17 = vsel %vm1687_vm11, %v1756_v16, -inf }
 0x38a   : > { %1761 = vmax.xlane.f32.xlu2 %v1760_v17 }
 0x390   : > { %v1758_v19 = vpop.f32.mrf.mxu1 }
 0x3a8   : > { %v1690_v20 = vpop.xlane.xlu1 %1689 }
 0x3a9   : > { %v1691_v21 = vsub.f32 %v1683_v13, %v1690_v20 }
 0x3ab   : > { %v1692_v22 = vmul.f32 1.442695, %v1691_v21 }
 0x3ad   : > { %2916 = vpow2.f32 %v1692_v22 }
 0x3b3   : > { %v2917_v23 = vpop.eup %2916 }
 0x3b4   : > { %v1694_v24 = vsel %vm1687_vm11, %v2917_v23, 0.0 }
 0x3b5   : > { %1695 = vadd.xlane.f32.xlu1 %v1694_v24 }
 0x3ce   : > { %1847 = vrot.lane.b32.xlu1 %v1664_v7, %s2983_s6 }
 0x3fd   : > { %v1762_v28 = vpop.xlane.xlu2 %1761 }
 0x3fe   : > { %v1763_v29 = vsub.f32 %v1756_v16, %v1762_v28 }
 0x400   : > { %v1764_v30 = vmul.f32 1.442695, %v1763_v29 }
 0x402   : > { %2918 = vpow2.f32 %v1764_v30 }
 0x408   : > { %v2919_v31 = vpop.eup %2918 }
 0x409   : > { %v1766_v32 = vsel %vm1687_vm11, %v2919_v31, 0.0 }
 0x40a   : > { %1767 = vadd.xlane.f32.xlu2 %v1766_v32 }
 0x422   : > { %1786 = vrot.lane.b32.xlu2 %v3422_v59, %s2984_s21 }
 0x428   : > { %v1696_v35 = vpop.xlane.xlu1 %1695 }
 0x429   : > { %2920 = vrcp.f32 %v1696_v35  ;;  %v1708_v39 = vand.u32 2147483648, %v1696_v35  ;;  %v1706_v41 = vand.u32 2147483647, %v1696_v35  ;;  %vm1702_vm14 = vweird.f32 %v1696_v35 }
 0x42b   : > { %v1709_v43 = vor.u32 1.1754944e-38, %v1708_v39  ;;  %vm1707_vm0 = vcmp.eq.f32.partialorder %v1706_v41, 8.507059e+37 }
 0x42f   : > { %v2921_v36 = vpop.eup %2920 }
 0x430   : > { %v1698_v37 = vmul.f32 %v2921_v36, %v1696_v35  ;;  %vm1703_vm13 = vweird.f32 %v2921_v36 }
 0x431   : > { %vm1704_vm15 = vmor %vm1702_vm14, %vm1703_vm13 }
 0x432   : > { %v1699_v38 = vsub.f32 1.0, %v1698_v37 }
 0x434   : > { %v1700_v40 = vmul.f32 %v2921_v36, %v1699_v38 }
 0x436   : > { %v1701_v42 = vadd.f32 %v2921_v36, %v1700_v40 }
 0x438   : > { %v1705_v44 = vsel %vm1704_vm15, %v2921_v36, %v1701_v42 }
 0x439   : > { %v1710_v45 = vsel %vm1707_vm0, %v1709_v43, %v1705_v44 }
 0x43a   : > { %v1711_v46 = vmul.f32 %v2917_v23, %v1710_v45 }
 0x43c   : > { %v1712_v47 = vpack.c.bf16 %v1711_v46, %v1711_v46 }
 0x43e   : > { %2730 = vmatmul.msk.bf16.vlgmr.msra.gmra.mxu0 %vm1713_vm1, %v1712_v47  ;;  %v1662_v47 = vld [vmem:[%s3191_s8 + $0x8] sm:$0xf] }
 0x43f   : > { %1954 = vmatpush.bf16.xpose.msra.mxu0 %v1945_v48  ;;  %v1921_v48 = vsel %vm1811_vm12, %v1662_v47, 0 }
 0x440   : > { %v1848_v49 = vpop.permute.xlu1 %1847  ;;  %1930 = vmatpush.bf16.msra.mxu3 %v1921_v48 }
 0x441   : > { %2735 = vmatmul.msk.bf16.vlgmr.msrb.gmra.mxu1 %vm1667_vm10, %v1848_v49 }
 0x47d   : > { %v1768_v50 = vpop.xlane.xlu2 %1767 }
 0x47e   : > { %2922 = vrcp.f32 %v1768_v50  ;;  %v1780_v56 = vand.u32 2147483648, %v1768_v50  ;;  %v1778_v58 = vand.u32 2147483647, %v1768_v50  ;;  %vm1774_vm4 = vweird.f32 %v1768_v50 }
 0x480   : > { %v1781_v61 = vor.u32 1.1754944e-38, %v1780_v56  ;;  %vm1779_vm6 = vcmp.eq.f32.partialorder %v1778_v58, 8.507059e+37 }
 0x484   : > { %v2923_v51 = vpop.eup %2922 }
 0x485   : > { %v1770_v52 = vmul.f32 %v2923_v51, %v1768_v50  ;;  %v1787_v53 = vpop.permute.xlu2 %1786  ;;  %vm1775_vm2 = vweird.f32 %v2923_v51 }
 0x486   : > { %v1792_v54 = vsel %vm1717_vm9, %v1787_v53, 0  ;;  %vm1776_vm5 = vmor %vm1774_vm4, %vm1775_vm2 }
 0x487   : > { %v1771_v55 = vsub.f32 1.0, %v1770_v52  ;;  %1801 = vmatpush.bf16.msrb.mxu2 %v1792_v54 }
 0x489   : > { %v1772_v57 = vmul.f32 %v2923_v51, %v1771_v55 }
 0x48b   : > { %v1773_v60 = vadd.f32 %v2923_v51, %v1772_v57 }
 0x48d   : > { %v1777_v62 = vsel %vm1776_vm5, %v2923_v51, %v1773_v60 }
 0x48e   : > { %v1782_v63 = vsel %vm1779_vm6, %v1781_v61, %v1777_v62 }
 0x48f   : > { %v1783_v0 = vmul.f32 %v2919_v31, %v1782_v63 }
 0x491   : > { %v1784_v1 = vpack.c.bf16 %v1783_v0, %v1783_v0 }
 0x493   : > { %2732 = vmatmul.msk.bf16.vlgmr.msrb.gmra.mxu2 %vm1713_vm1, %v1784_v1 }
 0x4bb   : > { %v1730_v2 = vpop.f32.mrf.mxu0 }
 0x4bc   : > { %v1734_v3 = vpack.c.bf16 %v1730_v2, %v1730_v2 }
 0x4be   : > { %2734 = vmatmul.msk.bf16.vlgmr.msrb.gmra.mxu0 %vm1667_vm10, %v1734_v3  ;;  %v1866_v4 = vpop.f32.mrf.mxu1  ;;  %v1663_v3 = vld [vmem:[%s3191_s8 + $0xc] sm:$0xf] }
 0x4bf   : > { %v1870_v5 = vsel %vm1687_vm11, %v1866_v4, -inf }
 0x4c0   : > { %1871 = vmax.xlane.f32.xlu0 %v1870_v5 }
 0x4c3   : > { %v1732_v6 = vpop.f32.mrf.mxu0 }
 0x4c6   : > { %v1868_v7 = vpop.f32.mrf.mxu1 }
 0x4ce   : > { %2738 = vmatmul.msk.bf16.vlgmr.msra.gmra.mxu0 %vm1667_vm10, %v3450_v27 }
 0x516   : > { %v1803_v10 = vpop.f32.mrf.mxu2 }
 0x517   : > { %v1807_v11 = vpack.c.bf16 %v1803_v10, %v1803_v10 }
 0x519   : > { %2733 = vmatmul.msk.bf16.vlgmr.msrb.gmra.mxu3 %vm1667_vm10, %v1807_v11 }
 0x51e   : > { %v1805_v12 = vpop.f32.mrf.mxu2 }
 0x533   : > { %v1872_v13 = vpop.xlane.xlu0 %1871 }
 0x534   : > { %v1873_v14 = vsub.f32 %v1866_v4, %v1872_v13  ;;  %v2011_v4 = vsel %vm1811_vm12, %v1663_v3, 0 }
 0x536   : > { %v1874_v15 = vmul.f32 1.442695, %v1873_v14  ;;  %v2907_v14 = vld [vmem:[%s3651_s2] ss:$0 sm:$0xff] }
 0x538   : > { %2924 = vpow2.f32 %v1874_v15 }
 0x53b   : > { %v3469_v16 = vpop.f32.mrf.mxu0 }
 0x53e   : > { %v2925_v17 = vpop.eup %2924 }
 0x53f   : > { %v1876_v19 = vsel %vm1687_vm11, %v2925_v17, 0.0 }
 0x540   : > { %1877 = vadd.xlane.f32.xlu0 %v1876_v19 }
 0x543   : > { %v1845_v20 = vpop.f32.mrf.mxu0 }
 0x54b   : > { %v1956_v21 = vpop.f32.mrf.mxu0 }
 0x54c   : > { %v1960_v22 = vsel %vm1687_vm11, %v1956_v21, -inf }
 0x54d   : > { %1961 = vmax.xlane.f32.xlu1 %v1960_v22 }
 0x553   : > { %v1958_v23 = vpop.f32.mrf.mxu0 }
 0x554   : > { %1895 = vrot.lane.b32.xlu0 %v3422_v59, %s2983_s6 }
 0x59c   : > { %v3475_v24 = vpop.f32.mrf.mxu3 }
 0x59d   : > { %v1844_v5 = vadd.f32 %v3469_v16, %v3475_v24 }
 0x5a4   : > { %v1826_v25 = vpop.f32.mrf.mxu3 }
 0x5a5   : > { %v2846_v25 = vld [vmem:[%s3208_s24 + $0x8] sm:$0xff] }
 0x5a6   : > { %2095 = vmatpush.bf16.msrb.mxu3 %v2846_v25 }
 0x5b3   : > { %v1878_v27 = vpop.xlane.xlu0 %1877 }
 0x5b4   : > { %2926 = vrcp.f32 %v1878_v27  ;;  %v1890_v31 = vand.u32 2147483648, %v1878_v27  ;;  %v1888_v33 = vand.u32 2147483647, %v1878_v27  ;;  %vm1884_vm13 = vweird.f32 %v1878_v27 }
 0x5b6   : > { %v1891_v37 = vor.u32 1.1754944e-38, %v1890_v31  ;;  %vm1889_vm15 = vcmp.eq.f32.partialorder %v1888_v33, 8.507059e+37 }
 0x5ba   : > { %v2927_v28 = vpop.eup %2926 }
 0x5bb   : > { %v1880_v29 = vmul.f32 %v2927_v28, %v1878_v27  ;;  %vm1885_vm7 = vweird.f32 %v2927_v28 }
 0x5bc   : > { %vm1886_vm14 = vmor %vm1884_vm13, %vm1885_vm7 }
 0x5bd   : > { %v1881_v30 = vsub.f32 1.0, %v1880_v29 }
 0x5bf   : > { %v1882_v32 = vmul.f32 %v2927_v28, %v1881_v30 }
 0x5c0   : > { %v1962_v34 = vpop.xlane.xlu1 %1961 }
 0x5c1   : > { %v1883_v35 = vadd.f32 %v2927_v28, %v1882_v32  ;;  %v1963_v36 = vsub.f32 %v1956_v21, %v1962_v34 }
 0x5c3   : > { %v1887_v38 = vsel %vm1886_vm14, %v2927_v28, %v1883_v35  ;;  %v1964_v39 = vmul.f32 1.442695, %v1963_v36  ;;  %v2908_v36 = vld [vmem:[%s3653_s4] ss:$0 sm:$0xff] }
 0x5c4   : > { %v1892_v40 = vsel %vm1889_vm15, %v1891_v37, %v1887_v38 }
 0x5c5   : > { %v1893_v41 = vmul.f32 %v2925_v17, %v1892_v40  ;;  %2928 = vpow2.f32 %v1964_v39  ;;  %v2909_v39 = vld [vmem:[%s3654_s23] ss:$0 sm:$0xff] }
 0x5c6   : > { %v1896_v42 = vpop.permute.xlu0 %1895 }
 0x5c7   : > { %v1901_v43 = vsel %vm1717_vm9, %v1896_v42, 0  ;;  %v1894_v44 = vpack.c.bf16 %v1893_v41, %v1893_v41 }
 0x5c8   : > { %1910 = vmatpush.bf16.msra.mxu2 %v1901_v43  ;;  %v2854_v43 = vld [vmem:[%s3222_s16 + $0x38] sm:$0xff] }
 0x5c9   : > { %2211 = vmatpush.bf16.msrb.mxu0 %v2854_v43 }
 0x5cb   : > { %v2929_v45 = vpop.eup %2928  ;;  %2736 = vmatmul.msk.bf16.vlgmr.msra.gmra.mxu2 %vm1713_vm1, %v1894_v44  ;;  %v2910_v44 = vld [vmem:[%s3655_s29] ss:$0 sm:$0xff] }
 0x5cc   : > { %v1966_v46 = vsel %vm1687_vm11, %v2929_v45, 0.0  ;;  %2020 = vmatpush.bf16.msrb.mxu2 %v2011_v4 }
 0x5cd   : > { %1967 = vadd.xlane.f32.xlu1 %v1966_v46 }
 0x5e6   : > { %1985 = vrot.lane.b32.xlu1 %v3422_v59, %s2985_s28  ;;  %s3659_s28 = sld [smem:[#allocation27_spill]] (!%p2782_p8) }
 0x640   : > { %v1968_v49 = vpop.xlane.xlu1 %1967 }
 0x641   : > { %2930 = vrcp.f32 %v1968_v49  ;;  %v1980_v55 = vand.u32 2147483648, %v1968_v49  ;;  %vm1974_vm2 = vweird.f32 %v1968_v49  ;;  %v1978_v57 = vand.u32 2147483647, %v1968_v49 }
 0x643   : > { %v1981_v60 = vor.u32 1.1754944e-38, %v1980_v55  ;;  %vm1979_vm4 = vcmp.eq.f32.partialorder %v1978_v57, 8.507059e+37  ;;  %v2850_v55 = vld [vmem:[%s3222_s16 + $0x18] sm:$0xff] }
 0x647   : > { %v2931_v50 = vpop.eup %2930 }
 0x648   : > { %v1970_v51 = vmul.f32 %v2931_v50, %v1968_v49  ;;  %vm1975_vm0 = vweird.f32 %v2931_v50  ;;  %v2852_v49 = vld [vmem:[%s3222_s16 + $0x28] sm:$0xff] }
 0x649   : > { %vm1976_vm11 = vmor %vm1974_vm2, %vm1975_vm0 }
 0x64a   : > { %v1971_v52 = vsub.f32 1.0, %v1970_v51 }
 0x64c   : > { %v1972_v53 = vmul.f32 %v2931_v50, %v1971_v52  ;;  %v2851_v52 = vld [vmem:[%s3222_s16 + $0x20] sm:$0xff] }
 0x64e   : > { %v1973_v54 = vadd.f32 %v2931_v50, %v1972_v53  ;;  %v1912_v56 = vpop.f32.mrf.mxu2 }
 0x64f   : > { %v1916_v58 = vpack.c.bf16 %v1912_v56, %v1912_v56  ;;  %v2849_v56 = vld [vmem:[%s3222_s16 + $0x10] sm:$0xff] }
 0x650   : > { %v1977_v59 = vsel %vm1976_vm11, %v2931_v50, %v1973_v54 }
 0x651   : > { %2737 = vmatmul.msk.bf16.vlgmr.msra.gmra.mxu3 %vm1667_vm10, %v1916_v58  ;;  %v1982_v61 = vsel %vm1979_vm4, %v1981_v60, %v1977_v59  ;;  %v2848_v59 = vld [vmem:[%s3222_s16 + $0x8] sm:$0xff] }
 0x652   : > { %v1983_v63 = vmul.f32 %v2929_v45, %v1982_v61  ;;  %v2853_v45 = vld [vmem:[%s3222_s16 + $0x30] sm:$0xff] }
 0x653   : > { %2212 = vmatpush.bf16.msrb.mxu0 %v2853_v45 }
 0x654   : > { %v1984_v2 = vpack.c.bf16 %v1983_v63, %v1983_v63 }
 0x656   : > { %v1914_v62 = vpop.f32.mrf.mxu2 }
 0x657   : > { %2213 = vmatpush.bf16.msrb.mxu0 %v2852_v49 }
 0x658   : > { %v1986_v0 = vpop.permute.xlu1 %1985 }
 0x659   : > { %v1991_v1 = vsel %vm1717_vm9, %v1986_v0, 0  ;;  %v2847_v0 = vld [vmem:[%s3222_s16] sm:$0xff] }
 0x65a   : > { %2000 = vmatpush.bf16.msra.mxu1 %v1991_v1 }
 0x65b   : > { %2214 = vmatpush.bf16.msrb.mxu0 %v2851_v52 }
 0x65d   : > { %2739 = vmatmul.msk.bf16.vlgmr.msra.gmra.mxu1 %vm1713_vm1, %v1984_v2 }
 0x65f   : > { %2215 = vmatpush.bf16.msrb.mxu0 %v2850_v55 }
 0x663   : > { %2216 = vmatpush.bf16.msrb.mxu0 %v2849_v56 }
 0x667   : > { %2217 = vmatpush.bf16.msrb.mxu0 %v2848_v59 }
 0x66b   : > { %2218 = vmatpush.bf16.msrb.mxu0 %v2847_v0 }
 0x6d4   : > { %v1932_v6 = vpop.f32.mrf.mxu3 }
 0x6d5   : > { %v1936_v7 = vadd.f32 %v1932_v6, %v1844_v5 }
 0x6da   : > { %v2002_v8 = vpop.f32.mrf.mxu1 }
 0x6db   : > { %v2006_v9 = vpack.c.bf16 %v2002_v8, %v2002_v8 }
 0x6dc   : > { %v1934_v10 = vpop.f32.mrf.mxu3 }
 0x6dd   : > { %2740 = vmatmul.msk.bf16.vlgmr.msrb.gmra.mxu2 %vm1667_vm10, %v2006_v9 }
 0x6e2   : > { %v2004_v11 = vpop.f32.mrf.mxu1 }
 0x760   : > { %v2022_v12 = vpop.f32.mrf.mxu2 }
 0x761   : > { %v2026_v13 = vadd.f32 %v2022_v12, %v1936_v7 }
 0x763   : > { %v2027_v15 = vadd.f32 %v2026_v13, %v3388_v18  ;;  %v2845_v18 = vld [vmem:[%s3208_s24] sm:$0xff] }
 0x764   : > { %2096 = vmatpush.bf16.msrb.mxu3 %v2845_v18 }
 0x765   : > { %v3498_v16 = vadd.f32 %v2907_v14, %v2027_v15 }
 0x767   : > { %v2035_v17 = vsel %vm1517_vm3, %v3498_v16, 0.0 }
 0x768   : > { %v2024_v19 = vpop.f32.mrf.mxu2  ;;  %2036 = vadd.xlane.f32.xlu2 %v2035_v17 }
 0x7db   : > { %v2037_v20 = vpop.xlane.xlu2 %2036 }
 0x7dc   : > { %v2038_v21 = vmul.f32 %v2037_v20, %v3392_v26 }
 0x7de   : > { %v2039_v22 = vsub.f32 %v3498_v16, %v2038_v21 }
 0x7e0   : > { %v2040_v23 = vmul.f32 %v2039_v22, %v2039_v22 }
 0x7e2   : > { %v2041_v24 = vsel %vm1517_vm3, %v2040_v23, 0.0 }
 0x7e3   : > { %2042 = vadd.xlane.f32.xlu0 %v2041_v24 }
 0x856   : > { %v2043_v27 = vpop.xlane.xlu0 %2042 }
 0x857   : > { %v2044_v28 = vmul.f32 %v2043_v27, %v3392_v26 }
 0x859   : > { %v2045_v29 = vadd.f32 1e-06, %v2044_v28  ;;  %v2911_v28 = vld [vmem:[%s1003_s15] ss:$0 sm:$0xff] }
 0x85b   : > { %2932 = vrsqrt.f32 %v2045_v29  ;;  %vm2052_vm10 = vweird.f32 %v2045_v29 }
 0x861   : > { %v2933_v30 = vpop.eup %2932 }
 0x862   : > { %v2047_v31 = vmul.f32 %v2933_v30, %v2045_v29  ;;  %vm2053_vm9 = vweird.f32 %v2933_v30 }
 0x863   : > { %vm2054_vm12 = vmor %vm2052_vm10, %vm2053_vm9 }
 0x864   : > { %v2048_v32 = vmul.f32 %v2933_v30, %v2047_v31 }
 0x866   : > { %v2049_v33 = vmul.f32 0.5, %v2048_v32 }
 0x868   : > { %v2050_v34 = vsub.f32 1.5, %v2049_v33 }
 0x86a   : > { %v2051_v35 = vmul.f32 %v2933_v30, %v2050_v34 }
 0x86c   : > { %v2055_v37 = vsel %vm2054_vm12, %v2933_v30, %v2051_v35 }
 0x86d   : > { %v2056_v38 = vmul.f32 %v2055_v37, %v2039_v22 }
 0x86f   : > { %v2060_v40 = vmul.f32 %v2908_v36, %v2056_v38 }
 0x871   : > { %v2064_v41 = vadd.f32 %v2909_v39, %v2060_v40 }
 0x873   : > { %v2065_v42 = vpack.c.bf16 %v2064_v41, %v2064_v41 }
 0x875   : > { %2749 = vmatmul.msk.bf16.vlgmr.msrb.gmra.mxu3 %vm1576_vm8, %v2065_v42 }
 0x8f8   : > { %v2098_v46 = vpop.f32.mrf.mxu3 }
 0x8f9   : > { %v2099_v47 = vadd.f32 %v2910_v44, %v2098_v46 }
 0x8fb   : > { %v2103_v48 = vmul.f32 0.70710677, %v2099_v47  ;;  %v2102_v24 = vmul.f32 0.5, %v2099_v47 }
 0x8fd   : > { %v2104_v50 = vand.u32 2147483647, %v2103_v48  ;;  %vm2137_vm7 = vcmp.ge.f32.partialorder %v2103_v48, 0.0 }
 0x8ff   : > { %v2105_v51 = vmul.f32 0.3275911, %v2104_v50  ;;  %v2131_v5 = vsub.f32 0.0, %v2104_v50 }
 0x900   : > { %v2100_v53 = vpop.f32.mrf.mxu3 }
 0x901   : > { %v2106_v54 = vadd.f32 1.0, %v2105_v51  ;;  %v2132_v8 = vmul.f32 %v2131_v5, %v2104_v50 }
 0x903   : > { %2934 = vrcp.f32 %v2106_v54  ;;  %v2118_v61 = vand.u32 2147483648, %v2106_v54  ;;  %v2116_v63 = vand.u32 2147483647, %v2106_v54  ;;  %vm2112_vm1 = vweird.f32 %v2106_v54 }
 0x904   : > { %v2133_v11 = vmul.f32 1.442695, %v2132_v8 }
 0x905   : > { %v2119_v2 = vor.u32 1.1754944e-38, %v2118_v61  ;;  %vm2117_vm6 = vcmp.eq.f32.partialorder %v2116_v63, 8.507059e+37 }
 0x906   : > { %2936 = vpow2.f32 %v2133_v11 }
 0x909   : > { %v2935_v57 = vpop.eup %2934 }
 0x90a   : > { %v2108_v58 = vmul.f32 %v2935_v57, %v2106_v54  ;;  %vm2113_vm8 = vweird.f32 %v2935_v57 }
 0x90b   : > { %vm2114_vm5 = vmor %vm2112_vm1, %vm2113_vm8 }
 0x90c   : > { %v2109_v60 = vsub.f32 1.0, %v2108_v58  ;;  %v2937_v19 = vpop.eup %2936 }
 0x90e   : > { %v2110_v62 = vmul.f32 %v2935_v57, %v2109_v60 }
 0x910   : > { %v2111_v1 = vadd.f32 %v2935_v57, %v2110_v62 }
 0x912   : > { %v2115_v3 = vsel %vm2114_vm5, %v2935_v57, %v2111_v1 }
 0x913   : > { %v2120_v4 = vsel %vm2117_vm6, %v2119_v2, %v2115_v3 }
 0x914   : > { %v2122_v6 = vmul.f32 1.0614054, %v2120_v4 }
 0x916   : > { %v2123_v7 = vadd.f32 -1.4531521, %v2122_v6 }
 0x918   : > { %v2124_v9 = vmul.f32 %v2123_v7, %v2120_v4 }
 0x91a   : > { %v2125_v10 = vadd.f32 1.4214138, %v2124_v9 }
 0x91c   : > { %v2126_v12 = vmul.f32 %v2125_v10, %v2120_v4 }
 0x91e   : > { %v2127_v13 = vadd.f32 -0.28449672, %v2126_v12 }
 0x920   : > { %v2128_v14 = vmul.f32 %v2127_v13, %v2120_v4 }
 0x922   : > { %v2129_v15 = vadd.f32 0.2548296, %v2128_v14 }
 0x924   : > { %v2130_v17 = vmul.f32 %v2129_v15, %v2120_v4 }
 0x926   : > { %v2135_v20 = vmul.f32 %v2937_v19, %v2130_v17 }
 0x928   : > { %v2136_v21 = vsub.f32 1.0, %v2135_v20 }
 0x92a   : > { %v2138_v22 = vsub.f32 0.0, %v2136_v21 }
 0x92c   : > { %v2139_v23 = vsel %vm2137_vm7, %v2136_v21, %v2138_v22 }
 0x92d   : > { %v2140_v25 = vadd.f32 1.0, %v2139_v23 }
 0x92f   : > { %v2141_v18 = vmul.f32 %v2140_v25, %v2102_v24 }
 0x931   : > { %v2142_v27 = vpack.c.bf16 %v2141_v18, %v2141_v18 }
 0x933   : > { %2219 = vmatmul.bf16.vlgmr.msrb.gmra.mxu0 %v2142_v27 }
 0x9b0   : > { %v2220_v29 = vpop.f32.mrf.mxu0 }
 0x9b1   : > { %v2221_v30 = vadd.f32 %v2911_v28, %v2220_v29 }
 0x9b3   : > { %v2224_v31 = vadd.f32 %v2221_v30, %v3498_v16 }
 0x9b4   : > { %2229 = sbr.rel (%p2782_p8) target bundleno = 2759 (0xac7), region = 124 }
 0x9b5   : > { %2225 = vst.msk [vmem:[#allocation2] sm:$0x3f] %vm1517_vm3, %v2224_v31 }
 0x9b8   : > { %v2222_v32 = vpop.f32.mrf.mxu0 }
 0x9b9   : > { %vm2232_vm13 = vcmask 254976   ;;  %v2938_v47 = vld [vmem:[%s3658_s26] ss:$0 sm:$0xff] }
 0x9ba   : > { %v2233_v33 = vsel %vm2232_vm13, %v2224_v31, 0.0 }
 0x9bb   : > { %2234 = vadd.xlane.f32.xlu0 %v2233_v33 }
 0xa2e   : > { %v2235_v34 = vpop.xlane.xlu0 %2234 }
 0xa2f   : > { %v2236_v35 = vmul.f32 %v2235_v34, %v3392_v26 }
 0xa31   : > { %v2237_v36 = vsub.f32 %v2224_v31, %v2236_v35 }
 0xa33   : > { %v2238_v37 = vmul.f32 %v2237_v36, %v2237_v36 }
 0xa35   : > { %v2239_v38 = vsel %vm2232_vm13, %v2238_v37, 0.0 }
 0xa36   : > { %2240 = vadd.xlane.f32.xlu0 %v2239_v38 }
 0xaa9   : > { %v2241_v39 = vpop.xlane.xlu0 %2240 }
 0xaaa   : > { %v2242_v16 = vmul.f32 %v2241_v39, %v3392_v26  ;;  %v2939_v26 = vld [vmem:[%s3659_s28] ss:$0 sm:$0xff] }
 0xaac   : > { %v2243_v40 = vadd.f32 1e-06, %v2242_v16 }
 0xaae   : > { %2940 = vrsqrt.f32 %v2243_v40  ;;  %vm2250_vm14 = vweird.f32 %v2243_v40 }
 0xab4   : > { %v2941_v41 = vpop.eup %2940 }
 0xab5   : > { %v2245_v42 = vmul.f32 %v2941_v41, %v2243_v40  ;;  %vm2251_vm3 = vweird.f32 %v2941_v41 }
 0xab6   : > { %vm2252_vm15 = vmor %vm2250_vm14, %vm2251_vm3 }
 0xab7   : > { %v2246_v43 = vmul.f32 %v2941_v41, %v2245_v42 }
 0xab9   : > { %v2247_v44 = vmul.f32 0.5, %v2246_v43 }
 0xabb   : > { %v2248_v45 = vsub.f32 1.5, %v2247_v44 }
 0xabd   : > { %v2249_v46 = vmul.f32 %v2941_v41, %v2248_v45 }
 0xabf   : > { %v2253_v48 = vsel %vm2252_vm15, %v2941_v41, %v2249_v46 }
 0xac0   : > { %v2254_v49 = vmul.f32 %v2253_v48, %v2237_v36 }
 0xac2   : > { %v2258_v50 = vmul.f32 %v2938_v47, %v2254_v49 }
 0xac4   : > { %v2262_v51 = vadd.f32 %v2939_v26, %v2258_v50 }
 0xac6   : > { %2263 = vst.msk [vmem:[%s3227_s9] sm:$0x3] %vm2232_vm13, %v2262_v51 }
 0xac7 PF: > { %s3660_s7 = sld [smem:[#allocation6_spill]] }
 0xac8   : > { %s3661_s5 = sld [smem:[#allocation4_spill]] }
 0xac9   : > { %s3662_s26 = sld [smem:[#allocation5_spill]] }
 0xaca   : > { %s3663_s27 = sld [smem:[#allocation7_spill]] }
 0xacb   : > { %s3664_s28 = sld [smem:[#allocation8_spill]] }
 0xacd   : > { %s34_s6 = sadd.s32 1, %s3660_s7  }
 0xace   : > { %p31_p9 = scmp.ge.s32.totalorder %s34_s6, 6  }
 0xad0   :  { %33 = sbr.rel (!%p31_p9) target bundleno = 21 (0x15), region = 203 }

</bundles_post_ra>
